<compile_context>
chip_gen: v5e
topology: v5e:2x2
jax: 0.10.0
libtpu: 0.0.40
codegen_flags: <defaults>
</compile_context>

<pallas_src>
import functools

import jax
import jax.numpy as jnp
from jax.experimental import pallas as pl
from jax.experimental.pallas import tpu as pltpu


def _discrete_lstm_kernel(x_ref, h0_ref, c0_ref,
                          w1_ref, b1_ref,
                          wih_ref, bc_ref, whh_ref,
                          w2_ref, b2_ref,
                          wh_ref, bh_ref,
                          out_ref, hN_ref, cN_ref,
                          gx, hs,
                          *, num_actions, seq_len, compute_dtype):
    f32 = jnp.float32
    cd = compute_dtype
    BP, H = h0_ref.shape
    T = seq_len

    # ---------- pre-pass: batched over all T*BP rows (runs once) ----------
    a1 = jnp.tanh(jnp.dot(x_ref[...].astype(cd), w1_ref[...],
                          preferred_element_type=f32) + b1_ref[...])
    # fused lane-dense gate slab: one (T*BP, 4H) matmul + one store;
    # LSTM biases (bih + bhh) are pre-summed into bc.
    gx[...] = (jnp.dot(a1.astype(cd), wih_ref[...],
                       preferred_element_type=f32) + bc_ref[...])

    whh = whh_ref[...]            # fused (H, 4H) recurrent weight, loop-invariant
    # TODO(synk): staged-MXU RHS (pltpu.matmul_push_rhs/acc_lhs/pop) for whh is
    # left out (needs MXU-shape padding); the fused dot below is already a
    # single MXU push per serial step.

    # ---------- recurrence: one fused h @ Whh + gate math per step ----------
    def step(t, carry):
        h, c = carry
        r = pl.ds(pl.multiple_of(t * BP, BP), BP)   # sublane-aligned row group
        gates = gx[r, :] + jnp.dot(h.astype(cd), whh,
                                   preferred_element_type=f32)
        i_g = jax.nn.sigmoid(gates[:, 0 * H:1 * H])
        f_g = jax.nn.sigmoid(gates[:, 1 * H:2 * H])
        g_g = jnp.tanh(gates[:, 2 * H:3 * H])
        o_g = jax.nn.sigmoid(gates[:, 3 * H:4 * H])
        c = f_g * c + i_g * g_g
        h = o_g * jnp.tanh(c)
        hs[r, :] = h                                # own sublane group per step
        return h, c

    h_fin, c_fin = jax.lax.fori_loop(
        0, T, step, (h0_ref[...], c0_ref[...]), unroll=min(T, 8))
    hN_ref[...] = h_fin
    cN_ref[...] = c_fin

    # ---------- post-pass: fc2 + fused (action|value) head, lane-dense ----------
    a2 = jnp.tanh(jnp.dot(hs[...].astype(cd), w2_ref[...],
                          preferred_element_type=f32) + b2_ref[...])
    head = jnp.dot(a2.astype(cd), wh_ref[...],
                   preferred_element_type=f32) + bh_ref[...]
    lane = jax.lax.broadcasted_iota(jnp.int32, head.shape, 1)
    is_act = lane < num_actions
    masked = jnp.where(is_act, head, -jnp.inf)      # mask stays in f32
    m = jnp.max(masked, axis=-1, keepdims=True)
    lse = m + jnp.log(jnp.sum(jnp.exp(masked - m), axis=-1, keepdims=True))
    # lanes [0, A): log_softmax(logits); lane A: raw value; rest: ignored pad
    out_ref[...] = jnp.where(is_act, head - lse, head)


def prepare_params(params, *, mxu_dtype=jnp.float32):
    """One-time weight preprocessing (call once; reuse across forwards)."""
    H = params["whh"].shape[0]
    A = params["wa"].shape[1]
    P = max(128, pl.cdiv(A + 1, 128) * 128)     # padded fused-head lane width
    w_head = jnp.zeros((H, P), jnp.float32)
    w_head = w_head.at[:, :A].set(params["wa"]).at[:, A:A + 1].set(params["wv"])
    b_head = jnp.zeros((1, P), jnp.float32)
    b_head = b_head.at[:, :A].set(params["ba"]).at[:, A:A + 1].set(params["bv"])
    prep = {
        "w1": params["w1"].astype(mxu_dtype),
        "b1": params["b1"].astype(jnp.float32),
        "wih": params["wih"].astype(mxu_dtype),          # (H0, 4H), gates i,f,g,o
        "bc": (params["bih"] + params["bhh"]).astype(jnp.float32),
        "whh": params["whh"].astype(mxu_dtype),          # (H, 4H) fused
        "w2": params["w2"].astype(mxu_dtype),
        "b2": params["b2"].astype(jnp.float32),
        "w_head": w_head.astype(mxu_dtype),
        "b_head": b_head,
    }
    return prep, A, P


def make_discrete_lstm(params, *, mxu_dtype=jnp.float32):
    """Builds a jitted forward with all weight preprocessing hoisted out.

    forward(x (B,T,S), hidden ((1,B,H),(1,B,H)))
        -> (log_prob (B,T,A), value (B,T,1), (h_n, c_n))
    """
    prep, A, P = prepare_params(params, mxu_dtype=mxu_dtype)
    H = params["whh"].shape[0]

    @jax.jit
    def forward(x, hidden):
        B, T, S = x.shape
        BP = pl.cdiv(B, 8) * 8           # pad batch up to the sublane width
        TBP = T * BP

        # time-major, batch-padded flatten: row index = t*BP + b
        xt = jnp.transpose(x, (1, 0, 2)).astype(jnp.float32)   # (T, B, S)
        x_flat = jnp.zeros((T, BP, S), jnp.float32).at[:, :B].set(xt)
        x_flat = x_flat.reshape(TBP, S)
        h0 = jnp.zeros((BP, H), jnp.float32).at[:B].set(hidden[0][0])
        c0 = jnp.zeros((BP, H), jnp.float32).at[:B].set(hidden[1][0])

        args = (x_flat, h0, c0, prep["w1"], prep["b1"],
                prep["wih"], prep["bc"], prep["whh"],
                prep["w2"], prep["b2"], prep["w_head"], prep["b_head"])

        def full_spec(a):
            n = a.ndim
            return pl.BlockSpec(a.shape, lambda i, _n=n: (0,) * _n)

        out, h_n, c_n = pl.pallas_call(
            functools.partial(_discrete_lstm_kernel, num_actions=A,
                              seq_len=T, compute_dtype=mxu_dtype),
            grid=(1,),                   # single launch; time loop in-kernel
            # TODO(synk): on v7x, add a leading "parallel" batch-chunk grid
            # axis to use both TensorCores once B grows beyond a few sublane
            # groups; at these sizes a single grid point is optimal.
            in_specs=[full_spec(a) for a in args],
            out_specs=[
                pl.BlockSpec((TBP, P), lambda i: (0, 0)),
                pl.BlockSpec((BP, H), lambda i: (0, 0)),
                pl.BlockSpec((BP, H), lambda i: (0, 0)),
            ],
            out_shape=[
                jax.ShapeDtypeStruct((TBP, P), jnp.float32),
                jax.ShapeDtypeStruct((BP, H), jnp.float32),
                jax.ShapeDtypeStruct((BP, H), jnp.float32),
            ],
            scratch_shapes=[
                pltpu.VMEM((TBP, 4 * H), jnp.float32),   # fused gate slab gx
                pltpu.VMEM((TBP, H), jnp.float32),       # hs (all hidden states)
            ],
            compiler_params=pltpu.CompilerParams(
                dimension_semantics=("arbitrary",)),
        )(*args)

        out = jnp.transpose(out.reshape(T, BP, P)[:, :B], (1, 0, 2))   # (B,T,P)
        log_prob = out[:, :, :A]
        value = out[:, :, A:A + 1]
        return log_prob, value, (h_n[:B][None], c_n[:B][None])

    return forward


def init_params(key, state_dim, action_dim, hidden_size=(32, 32)):
    """Deterministic parameter init matching the module's shapes.
    Linear weights stored transposed (in_features, out_features) so the kernel
    computes y = x @ W + b.  LSTM biases are 1.0, fc biases 0.0 (as in the
    reference __init__)."""
    H0, H = hidden_size
    ks = jax.random.split(key, 6)

    def kaiming(k, fan_in, shape):
        return (jnp.sqrt(2.0 / fan_in)
                * jax.random.normal(k, shape, jnp.float32))

    return {
        "w1": kaiming(ks[0], state_dim, (state_dim, H0)),
        "b1": jnp.zeros((1, H0), jnp.float32),
        # (orthogonal in the reference; any deterministic full-rank init is
        #  fine for this synthetic kernel)
        "wih": 0.2 * jax.random.normal(ks[1], (H0, 4 * H), jnp.float32),
        "whh": 0.2 * jax.random.normal(ks[2], (H, 4 * H), jnp.float32),
        "bih": jnp.ones((1, 4 * H), jnp.float32),
        "bhh": jnp.ones((1, 4 * H), jnp.float32),
        "w2": kaiming(ks[3], H, (H, H)),
        "b2": jnp.zeros((1, H), jnp.float32),
        "wa": kaiming(ks[4], H, (H, action_dim)),
        "ba": jnp.zeros((1, action_dim), jnp.float32),
        "wv": kaiming(ks[5], H, (H, 1)),
        "bv": jnp.zeros((1, 1), jnp.float32),
    }


def reference_forward(x, hidden, p):
    """Pure-JAX reference of the PyTorch forward (eval path)."""
    h, c = hidden[0][0], hidden[1][0]
    H = h.shape[-1]
    a1 = jnp.tanh(x @ p["w1"] + p["b1"])                 # (B, T, H0)

    def step(carry, xt):
        h, c = carry
        gates = xt @ p["wih"] + p["bih"] + h @ p["whh"] + p["bhh"]
        i = jax.nn.sigmoid(gates[:, 0 * H:1 * H])
        f = jax.nn.sigmoid(gates[:, 1 * H:2 * H])
        g = jnp.tanh(gates[:, 2 * H:3 * H])
        o = jax.nn.sigmoid(gates[:, 3 * H:4 * H])
        c = f * c + i * g
        h = o * jnp.tanh(c)
        return (h, c), h

    (h, c), hs = jax.lax.scan(step, (h, c), jnp.transpose(a1, (1, 0, 2)))
    hs = jnp.transpose(hs, (1, 0, 2))                    # (B, T, H)
    a2 = jnp.tanh(hs @ p["w2"] + p["b2"])
    logits = a2 @ p["wa"] + p["ba"]
    log_prob = jax.nn.log_softmax(logits, axis=2)
    value = a2 @ p["wv"] + p["bv"]
    return log_prob, value, (h[None], c[None])


if __name__ == "__main__":
    B, T = 2, 8
    STATE_DIM, ACTION_DIM = 8, 4
    HIDDEN = (32, 32)

    key = jax.random.PRNGKey(0)
    k_x, k_h, k_c, k_p = jax.random.split(key, 4)

    x = jax.random.normal(k_x, (B, T, STATE_DIM), jnp.float32)
    h0 = 0.1 * jax.random.normal(k_h, (1, B, HIDDEN[1]), jnp.float32)
    c0 = 0.1 * jax.random.normal(k_c, (1, B, HIDDEN[1]), jnp.float32)
    params = init_params(k_p, STATE_DIM, ACTION_DIM, HIDDEN)

    # One-time weight prep + jitted forward; reusable across many calls with
    # zero per-call weight preprocessing.
    forward = make_discrete_lstm(params, mxu_dtype=jnp.float32)
    log_prob, value, (h_n, c_n) = forward(x, (h0, c0))
    jax.block_until_ready((log_prob, value, h_n, c_n))

    # correctness check against a pure-JAX reference (f32 path, tight)
    r_lp, r_v, (r_h, r_c) = reference_forward(x, (h0, c0), params)
    assert log_prob.shape == (B, T, ACTION_DIM)
    assert value.shape == (B, T, 1)
    assert h_n.shape == (1, B, HIDDEN[1]) and c_n.shape == (1, B, HIDDEN[1])
    for got, want in ((log_prob, r_lp), (value, r_v), (h_n, r_h), (c_n, r_c)):
        assert jnp.allclose(got, want, atol=2e-4, rtol=2e-4), "mismatch vs reference"

    # bf16 MXU knob (v6e/v7x): bf16 matmul operands, f32 accumulation/state.
    forward_bf16 = make_discrete_lstm(params, mxu_dtype=jnp.bfloat16)
    lp16, v16, (h16, c16) = forward_bf16(x, (h0, c0))
    jax.block_until_ready((lp16, v16, h16, c16))
    for got, want in ((lp16, r_lp), (v16, r_v), (h16, r_h), (c16, r_c)):
        assert jnp.all(jnp.isfinite(got)), "non-finite bf16 output"
        assert jnp.allclose(got, want, atol=0.25, rtol=0.05), "bf16 path too far off"

    print("KERNEL_OK")
</pallas_src>

<mosaic_0001>
module attributes {stable_mosaic.version = 11 : i64} {
  func.func @_discrete_lstm_kernel(%arg0: i32, %arg1: memref<64x8xf32, #tpu.memory_space<vmem>>, %arg2: memref<8x32xf32, #tpu.memory_space<vmem>>, %arg3: memref<8x32xf32, #tpu.memory_space<vmem>>, %arg4: memref<8x32xf32, #tpu.memory_space<vmem>>, %arg5: memref<1x32xf32, #tpu.memory_space<vmem>>, %arg6: memref<32x128xf32, #tpu.memory_space<vmem>>, %arg7: memref<1x128xf32, #tpu.memory_space<vmem>>, %arg8: memref<32x128xf32, #tpu.memory_space<vmem>>, %arg9: memref<32x32xf32, #tpu.memory_space<vmem>>, %arg10: memref<1x32xf32, #tpu.memory_space<vmem>>, %arg11: memref<32x128xf32, #tpu.memory_space<vmem>>, %arg12: memref<1x128xf32, #tpu.memory_space<vmem>>, %arg13: memref<64x128xf32, #tpu.memory_space<vmem>>, %arg14: memref<8x32xf32, #tpu.memory_space<vmem>>, %arg15: memref<8x32xf32, #tpu.memory_space<vmem>>, %arg16: memref<64x128xf32, #tpu.memory_space<vmem>>, %arg17: memref<64x32xf32, #tpu.memory_space<vmem>>) attributes {dimension_semantics = [#tpu.dimension_semantics<arbitrary>], iteration_bounds = array<i64: 1>, scalar_prefetch = 0 : i64, scratch_operands = 2 : i64, tpu.core_type = #tpu.core_type<tc>, window_params = [{pipeline_mode = #tpu.pipeline_mode<synchronous>, transform_indices = @transform_0, window_bounds = array<i64: 64, 8>}, {pipeline_mode = #tpu.pipeline_mode<synchronous>, transform_indices = @transform_1, window_bounds = array<i64: 8, 32>}, {pipeline_mode = #tpu.pipeline_mode<synchronous>, transform_indices = @transform_2, window_bounds = array<i64: 8, 32>}, {pipeline_mode = #tpu.pipeline_mode<synchronous>, transform_indices = @transform_3, window_bounds = array<i64: 8, 32>}, {pipeline_mode = #tpu.pipeline_mode<synchronous>, transform_indices = @transform_4, window_bounds = array<i64: 1, 32>}, {pipeline_mode = #tpu.pipeline_mode<synchronous>, transform_indices = @transform_5, window_bounds = array<i64: 32, 128>}, {pipeline_mode = #tpu.pipeline_mode<synchronous>, transform_indices = @transform_6, window_bounds = array<i64: 1, 128>}, {pipeline_mode = #tpu.pipeline_mode<synchronous>, transform_indices = @transform_7, window_bounds = array<i64: 32, 128>}, {pipeline_mode = #tpu.pipeline_mode<synchronous>, transform_indices = @transform_8, window_bounds = array<i64: 32, 32>}, {pipeline_mode = #tpu.pipeline_mode<synchronous>, transform_indices = @transform_9, window_bounds = array<i64: 1, 32>}, {pipeline_mode = #tpu.pipeline_mode<synchronous>, transform_indices = @transform_10, window_bounds = array<i64: 32, 128>}, {pipeline_mode = #tpu.pipeline_mode<synchronous>, transform_indices = @transform_11, window_bounds = array<i64: 1, 128>}, {pipeline_mode = #tpu.pipeline_mode<synchronous>, transform_indices = @transform_12, window_bounds = array<i64: 64, 128>}, {pipeline_mode = #tpu.pipeline_mode<synchronous>, transform_indices = @transform_13, window_bounds = array<i64: 8, 32>}, {pipeline_mode = #tpu.pipeline_mode<synchronous>, transform_indices = @transform_14, window_bounds = array<i64: 8, 32>}]} {
    %c0 = arith.constant 0 : index
    %c0_0 = arith.constant 0 : index
    %0 = vector.load %arg1[%c0, %c0_0] : memref<64x8xf32, #tpu.memory_space<vmem>>, vector<64x8xf32>
    %c0_1 = arith.constant 0 : index
    %c0_2 = arith.constant 0 : index
    %1 = vector.load %arg4[%c0_1, %c0_2] : memref<8x32xf32, #tpu.memory_space<vmem>>, vector<8x32xf32>
    %cst = arith.constant dense<0.000000e+00> : vector<64x32xf32>
    %2 = tpu.matmul %0, %1, %cst {dimension_numbers = #tpu.dot_dimension_numbers<[1], [0], [0], [1], [0, 0, 1, 1], [], []>} : vector<64x8xf32>, vector<8x32xf32>, vector<64x32xf32> -> vector<64x32xf32>
    %c0_3 = arith.constant 0 : index
    %c0_4 = arith.constant 0 : index
    %3 = vector.load %arg5[%c0_3, %c0_4] : memref<1x32xf32, #tpu.memory_space<vmem>>, vector<1x32xf32>
    %4 = vector.broadcast %3 : vector<1x32xf32> to vector<64x32xf32>
    %5 = arith.addf %2, %4 : vector<64x32xf32>
    %6 = math.tanh %5 : vector<64x32xf32>
    %c0_5 = arith.constant 0 : index
    %c0_6 = arith.constant 0 : index
    %7 = vector.load %arg6[%c0_5, %c0_6] : memref<32x128xf32, #tpu.memory_space<vmem>>, vector<32x128xf32>
    %cst_7 = arith.constant dense<0.000000e+00> : vector<64x128xf32>
    %8 = tpu.matmul %6, %7, %cst_7 {dimension_numbers = #tpu.dot_dimension_numbers<[1], [0], [0], [1], [0, 0, 1, 1], [], []>} : vector<64x32xf32>, vector<32x128xf32>, vector<64x128xf32> -> vector<64x128xf32>
    %c0_8 = arith.constant 0 : index
    %c0_9 = arith.constant 0 : index
    %9 = vector.load %arg7[%c0_8, %c0_9] : memref<1x128xf32, #tpu.memory_space<vmem>>, vector<1x128xf32>
    %10 = vector.broadcast %9 : vector<1x128xf32> to vector<64x128xf32>
    %11 = arith.addf %8, %10 : vector<64x128xf32>
    %c0_10 = arith.constant 0 : index
    %c0_11 = arith.constant 0 : index
    %12 = vector.load %arg16[%c0_10, %c0_11] : memref<64x128xf32, #tpu.memory_space<vmem>>, vector<64x128xf32>
    tpu.vector_store %arg16[%c0_10, %c0_11], %11 {strides = array<i32>} : memref<64x128xf32, #tpu.memory_space<vmem>>, vector<64x128xf32>,
    %c0_12 = arith.constant 0 : index
    %c0_13 = arith.constant 0 : index
    %13 = vector.load %arg8[%c0_12, %c0_13] : memref<32x128xf32, #tpu.memory_space<vmem>>, vector<32x128xf32>
    %c0_14 = arith.constant 0 : index
    %c0_15 = arith.constant 0 : index
    %14 = vector.load %arg2[%c0_14, %c0_15] : memref<8x32xf32, #tpu.memory_space<vmem>>, vector<8x32xf32>
    %c0_16 = arith.constant 0 : index
    %c0_17 = arith.constant 0 : index
    %15 = vector.load %arg3[%c0_16, %c0_17] : memref<8x32xf32, #tpu.memory_space<vmem>>, vector<8x32xf32>
    %c0_i32 = arith.constant 0 : i32
    %c8_i32 = arith.constant 8 : i32
    %16 = arith.muli %c0_i32, %c8_i32 : i32
    %17 = tpu.assume_multiple %16, 8 : i32
    %18 = arith.index_cast %17 : i32 to index
    %c0_18 = arith.constant 0 : index
    %19 = vector.load %arg16[%18, %c0_18] : memref<64x128xf32, #tpu.memory_space<vmem>>, vector<8x128xf32>
    %cst_19 = arith.constant dense<0.000000e+00> : vector<8x128xf32>
    %20 = tpu.matmul %14, %13, %cst_19 {dimension_numbers = #tpu.dot_dimension_numbers<[1], [0], [0], [1], [0, 0, 1, 1], [], []>} : vector<8x32xf32>, vector<32x128xf32>, vector<8x128xf32> -> vector<8x128xf32>
    %21 = arith.addf %19, %20 : vector<8x128xf32>
    %22 = vector.extract_strided_slice %21 {offsets = [0, 0], sizes = [8, 32], strides = [1, 1]} : vector<8x128xf32> to vector<8x32xf32>
    %23 = arith.negf %22 : vector<8x32xf32>
    %24 = math.exp %23 : vector<8x32xf32>
    %cst_20 = arith.constant 1.000000e+00 : f32
    %25 = vector.broadcast %cst_20 : f32 to vector<8x32xf32>
    %26 = arith.addf %25, %24 : vector<8x32xf32>
    %27 = arith.divf %25, %26 : vector<8x32xf32>
    %28 = vector.extract_strided_slice %21 {offsets = [0, 32], sizes = [8, 32], strides = [1, 1]} : vector<8x128xf32> to vector<8x32xf32>
    %29 = arith.negf %28 : vector<8x32xf32>
    %30 = math.exp %29 : vector<8x32xf32>
    %cst_21 = arith.constant 1.000000e+00 : f32
    %31 = vector.broadcast %cst_21 : f32 to vector<8x32xf32>
    %32 = arith.addf %31, %30 : vector<8x32xf32>
    %33 = arith.divf %31, %32 : vector<8x32xf32>
    %34 = vector.extract_strided_slice %21 {offsets = [0, 64], sizes = [8, 32], strides = [1, 1]} : vector<8x128xf32> to vector<8x32xf32>
    %35 = math.tanh %34 : vector<8x32xf32>
    %36 = vector.extract_strided_slice %21 {offsets = [0, 96], sizes = [8, 32], strides = [1, 1]} : vector<8x128xf32> to vector<8x32xf32>
    %37 = arith.negf %36 : vector<8x32xf32>
    %38 = math.exp %37 : vector<8x32xf32>
    %cst_22 = arith.constant 1.000000e+00 : f32
    %39 = vector.broadcast %cst_22 : f32 to vector<8x32xf32>
    %40 = arith.addf %39, %38 : vector<8x32xf32>
    %41 = arith.divf %39, %40 : vector<8x32xf32>
    %42 = arith.mulf %33, %15 : vector<8x32xf32>
    %43 = arith.mulf %27, %35 : vector<8x32xf32>
    %44 = arith.addf %42, %43 : vector<8x32xf32>
    %45 = math.tanh %44 : vector<8x32xf32>
    %46 = arith.mulf %41, %45 : vector<8x32xf32>
    %47 = arith.index_cast %17 : i32 to index
    %c0_23 = arith.constant 0 : index
    %48 = vector.load %arg17[%47, %c0_23] : memref<64x32xf32, #tpu.memory_space<vmem>>, vector<8x32xf32>
    tpu.vector_store %arg17[%47, %c0_23], %46 {strides = array<i32>} : memref<64x32xf32, #tpu.memory_space<vmem>>, vector<8x32xf32>,
    %c1_i32 = arith.constant 1 : i32
    %c8_i32_24 = arith.constant 8 : i32
    %49 = arith.muli %c1_i32, %c8_i32_24 : i32
    %50 = tpu.assume_multiple %49, 8 : i32
    %51 = arith.index_cast %50 : i32 to index
    %c0_25 = arith.constant 0 : index
    %52 = vector.load %arg16[%51, %c0_25] : memref<64x128xf32, #tpu.memory_space<vmem>>, vector<8x128xf32>
    %cst_26 = arith.constant dense<0.000000e+00> : vector<8x128xf32>
    %53 = tpu.matmul %46, %13, %cst_26 {dimension_numbers = #tpu.dot_dimension_numbers<[1], [0], [0], [1], [0, 0, 1, 1], [], []>} : vector<8x32xf32>, vector<32x128xf32>, vector<8x128xf32> -> vector<8x128xf32>
    %54 = arith.addf %52, %53 : vector<8x128xf32>
    %55 = vector.extract_strided_slice %54 {offsets = [0, 0], sizes = [8, 32], strides = [1, 1]} : vector<8x128xf32> to vector<8x32xf32>
    %56 = arith.negf %55 : vector<8x32xf32>
    %57 = math.exp %56 : vector<8x32xf32>
    %cst_27 = arith.constant 1.000000e+00 : f32
    %58 = vector.broadcast %cst_27 : f32 to vector<8x32xf32>
    %59 = arith.addf %58, %57 : vector<8x32xf32>
    %60 = arith.divf %58, %59 : vector<8x32xf32>
    %61 = vector.extract_strided_slice %54 {offsets = [0, 32], sizes = [8, 32], strides = [1, 1]} : vector<8x128xf32> to vector<8x32xf32>
    %62 = arith.negf %61 : vector<8x32xf32>
    %63 = math.exp %62 : vector<8x32xf32>
    %cst_28 = arith.constant 1.000000e+00 : f32
    %64 = vector.broadcast %cst_28 : f32 to vector<8x32xf32>
    %65 = arith.addf %64, %63 : vector<8x32xf32>
    %66 = arith.divf %64, %65 : vector<8x32xf32>
    %67 = vector.extract_strided_slice %54 {offsets = [0, 64], sizes = [8, 32], strides = [1, 1]} : vector<8x128xf32> to vector<8x32xf32>
    %68 = math.tanh %67 : vector<8x32xf32>
    %69 = vector.extract_strided_slice %54 {offsets = [0, 96], sizes = [8, 32], strides = [1, 1]} : vector<8x128xf32> to vector<8x32xf32>
    %70 = arith.negf %69 : vector<8x32xf32>
    %71 = math.exp %70 : vector<8x32xf32>
    %cst_29 = arith.constant 1.000000e+00 : f32
    %72 = vector.broadcast %cst_29 : f32 to vector<8x32xf32>
    %73 = arith.addf %72, %71 : vector<8x32xf32>
    %74 = arith.divf %72, %73 : vector<8x32xf32>
    %75 = arith.mulf %66, %44 : vector<8x32xf32>
    %76 = arith.mulf %60, %68 : vector<8x32xf32>
    %77 = arith.addf %75, %76 : vector<8x32xf32>
    %78 = math.tanh %77 : vector<8x32xf32>
    %79 = arith.mulf %74, %78 : vector<8x32xf32>
    %80 = arith.index_cast %50 : i32 to index
    %c0_30 = arith.constant 0 : index
    %81 = vector.load %arg17[%80, %c0_30] : memref<64x32xf32, #tpu.memory_space<vmem>>, vector<8x32xf32>
    tpu.vector_store %arg17[%80, %c0_30], %79 {strides = array<i32>} : memref<64x32xf32, #tpu.memory_space<vmem>>, vector<8x32xf32>,
    %c2_i32 = arith.constant 2 : i32
    %c8_i32_31 = arith.constant 8 : i32
    %82 = arith.muli %c2_i32, %c8_i32_31 : i32
    %83 = tpu.assume_multiple %82, 8 : i32
    %84 = arith.index_cast %83 : i32 to index
    %c0_32 = arith.constant 0 : index
    %85 = vector.load %arg16[%84, %c0_32] : memref<64x128xf32, #tpu.memory_space<vmem>>, vector<8x128xf32>
    %cst_33 = arith.constant dense<0.000000e+00> : vector<8x128xf32>
    %86 = tpu.matmul %79, %13, %cst_33 {dimension_numbers = #tpu.dot_dimension_numbers<[1], [0], [0], [1], [0, 0, 1, 1], [], []>} : vector<8x32xf32>, vector<32x128xf32>, vector<8x128xf32> -> vector<8x128xf32>
    %87 = arith.addf %85, %86 : vector<8x128xf32>
    %88 = vector.extract_strided_slice %87 {offsets = [0, 0], sizes = [8, 32], strides = [1, 1]} : vector<8x128xf32> to vector<8x32xf32>
    %89 = arith.negf %88 : vector<8x32xf32>
    %90 = math.exp %89 : vector<8x32xf32>
    %cst_34 = arith.constant 1.000000e+00 : f32
    %91 = vector.broadcast %cst_34 : f32 to vector<8x32xf32>
    %92 = arith.addf %91, %90 : vector<8x32xf32>
    %93 = arith.divf %91, %92 : vector<8x32xf32>
    %94 = vector.extract_strided_slice %87 {offsets = [0, 32], sizes = [8, 32], strides = [1, 1]} : vector<8x128xf32> to vector<8x32xf32>
    %95 = arith.negf %94 : vector<8x32xf32>
    %96 = math.exp %95 : vector<8x32xf32>
    %cst_35 = arith.constant 1.000000e+00 : f32
    %97 = vector.broadcast %cst_35 : f32 to vector<8x32xf32>
    %98 = arith.addf %97, %96 : vector<8x32xf32>
    %99 = arith.divf %97, %98 : vector<8x32xf32>
    %100 = vector.extract_strided_slice %87 {offsets = [0, 64], sizes = [8, 32], strides = [1, 1]} : vector<8x128xf32> to vector<8x32xf32>
    %101 = math.tanh %100 : vector<8x32xf32>
    %102 = vector.extract_strided_slice %87 {offsets = [0, 96], sizes = [8, 32], strides = [1, 1]} : vector<8x128xf32> to vector<8x32xf32>
    %103 = arith.negf %102 : vector<8x32xf32>
    %104 = math.exp %103 : vector<8x32xf32>
    %cst_36 = arith.constant 1.000000e+00 : f32
    %105 = vector.broadcast %cst_36 : f32 to vector<8x32xf32>
    %106 = arith.addf %105, %104 : vector<8x32xf32>
    %107 = arith.divf %105, %106 : vector<8x32xf32>
    %108 = arith.mulf %99, %77 : vector<8x32xf32>
    %109 = arith.mulf %93, %101 : vector<8x32xf32>
    %110 = arith.addf %108, %109 : vector<8x32xf32>
    %111 = math.tanh %110 : vector<8x32xf32>
    %112 = arith.mulf %107, %111 : vector<8x32xf32>
    %113 = arith.index_cast %83 : i32 to index
    %c0_37 = arith.constant 0 : index
    %114 = vector.load %arg17[%113, %c0_37] : memref<64x32xf32, #tpu.memory_space<vmem>>, vector<8x32xf32>
    tpu.vector_store %arg17[%113, %c0_37], %112 {strides = array<i32>} : memref<64x32xf32, #tpu.memory_space<vmem>>, vector<8x32xf32>,
    %c3_i32 = arith.constant 3 : i32
    %c8_i32_38 = arith.constant 8 : i32
    %115 = arith.muli %c3_i32, %c8_i32_38 : i32
    %116 = tpu.assume_multiple %115, 8 : i32
    %117 = arith.index_cast %116 : i32 to index
    %c0_39 = arith.constant 0 : index
    %118 = vector.load %arg16[%117, %c0_39] : memref<64x128xf32, #tpu.memory_space<vmem>>, vector<8x128xf32>
    %cst_40 = arith.constant dense<0.000000e+00> : vector<8x128xf32>
    %119 = tpu.matmul %112, %13, %cst_40 {dimension_numbers = #tpu.dot_dimension_numbers<[1], [0], [0], [1], [0, 0, 1, 1], [], []>} : vector<8x32xf32>, vector<32x128xf32>, vector<8x128xf32> -> vector<8x128xf32>
    %120 = arith.addf %118, %119 : vector<8x128xf32>
    %121 = vector.extract_strided_slice %120 {offsets = [0, 0], sizes = [8, 32], strides = [1, 1]} : vector<8x128xf32> to vector<8x32xf32>
    %122 = arith.negf %121 : vector<8x32xf32>
    %123 = math.exp %122 : vector<8x32xf32>
    %cst_41 = arith.constant 1.000000e+00 : f32
    %124 = vector.broadcast %cst_41 : f32 to vector<8x32xf32>
    %125 = arith.addf %124, %123 : vector<8x32xf32>
    %126 = arith.divf %124, %125 : vector<8x32xf32>
    %127 = vector.extract_strided_slice %120 {offsets = [0, 32], sizes = [8, 32], strides = [1, 1]} : vector<8x128xf32> to vector<8x32xf32>
    %128 = arith.negf %127 : vector<8x32xf32>
    %129 = math.exp %128 : vector<8x32xf32>
    %cst_42 = arith.constant 1.000000e+00 : f32
    %130 = vector.broadcast %cst_42 : f32 to vector<8x32xf32>
    %131 = arith.addf %130, %129 : vector<8x32xf32>
    %132 = arith.divf %130, %131 : vector<8x32xf32>
    %133 = vector.extract_strided_slice %120 {offsets = [0, 64], sizes = [8, 32], strides = [1, 1]} : vector<8x128xf32> to vector<8x32xf32>
    %134 = math.tanh %133 : vector<8x32xf32>
    %135 = vector.extract_strided_slice %120 {offsets = [0, 96], sizes = [8, 32], strides = [1, 1]} : vector<8x128xf32> to vector<8x32xf32>
    %136 = arith.negf %135 : vector<8x32xf32>
    %137 = math.exp %136 : vector<8x32xf32>
    %cst_43 = arith.constant 1.000000e+00 : f32
    %138 = vector.broadcast %cst_43 : f32 to vector<8x32xf32>
    %139 = arith.addf %138, %137 : vector<8x32xf32>
    %140 = arith.divf %138, %139 : vector<8x32xf32>
    %141 = arith.mulf %132, %110 : vector<8x32xf32>
    %142 = arith.mulf %126, %134 : vector<8x32xf32>
    %143 = arith.addf %141, %142 : vector<8x32xf32>
    %144 = math.tanh %143 : vector<8x32xf32>
    %145 = arith.mulf %140, %144 : vector<8x32xf32>
    %146 = arith.index_cast %116 : i32 to index
    %c0_44 = arith.constant 0 : index
    %147 = vector.load %arg17[%146, %c0_44] : memref<64x32xf32, #tpu.memory_space<vmem>>, vector<8x32xf32>
    tpu.vector_store %arg17[%146, %c0_44], %145 {strides = array<i32>} : memref<64x32xf32, #tpu.memory_space<vmem>>, vector<8x32xf32>,
    %c4_i32 = arith.constant 4 : i32
    %c8_i32_45 = arith.constant 8 : i32
    %148 = arith.muli %c4_i32, %c8_i32_45 : i32
    %149 = tpu.assume_multiple %148, 8 : i32
    %150 = arith.index_cast %149 : i32 to index
    %c0_46 = arith.constant 0 : index
    %151 = vector.load %arg16[%150, %c0_46] : memref<64x128xf32, #tpu.memory_space<vmem>>, vector<8x128xf32>
    %cst_47 = arith.constant dense<0.000000e+00> : vector<8x128xf32>
    %152 = tpu.matmul %145, %13, %cst_47 {dimension_numbers = #tpu.dot_dimension_numbers<[1], [0], [0], [1], [0, 0, 1, 1], [], []>} : vector<8x32xf32>, vector<32x128xf32>, vector<8x128xf32> -> vector<8x128xf32>
    %153 = arith.addf %151, %152 : vector<8x128xf32>
    %154 = vector.extract_strided_slice %153 {offsets = [0, 0], sizes = [8, 32], strides = [1, 1]} : vector<8x128xf32> to vector<8x32xf32>
    %155 = arith.negf %154 : vector<8x32xf32>
    %156 = math.exp %155 : vector<8x32xf32>
    %cst_48 = arith.constant 1.000000e+00 : f32
    %157 = vector.broadcast %cst_48 : f32 to vector<8x32xf32>
    %158 = arith.addf %157, %156 : vector<8x32xf32>
    %159 = arith.divf %157, %158 : vector<8x32xf32>
    %160 = vector.extract_strided_slice %153 {offsets = [0, 32], sizes = [8, 32], strides = [1, 1]} : vector<8x128xf32> to vector<8x32xf32>
    %161 = arith.negf %160 : vector<8x32xf32>
    %162 = math.exp %161 : vector<8x32xf32>
    %cst_49 = arith.constant 1.000000e+00 : f32
    %163 = vector.broadcast %cst_49 : f32 to vector<8x32xf32>
    %164 = arith.addf %163, %162 : vector<8x32xf32>
    %165 = arith.divf %163, %164 : vector<8x32xf32>
    %166 = vector.extract_strided_slice %153 {offsets = [0, 64], sizes = [8, 32], strides = [1, 1]} : vector<8x128xf32> to vector<8x32xf32>
    %167 = math.tanh %166 : vector<8x32xf32>
    %168 = vector.extract_strided_slice %153 {offsets = [0, 96], sizes = [8, 32], strides = [1, 1]} : vector<8x128xf32> to vector<8x32xf32>
    %169 = arith.negf %168 : vector<8x32xf32>
    %170 = math.exp %169 : vector<8x32xf32>
    %cst_50 = arith.constant 1.000000e+00 : f32
    %171 = vector.broadcast %cst_50 : f32 to vector<8x32xf32>
    %172 = arith.addf %171, %170 : vector<8x32xf32>
    %173 = arith.divf %171, %172 : vector<8x32xf32>
    %174 = arith.mulf %165, %143 : vector<8x32xf32>
    %175 = arith.mulf %159, %167 : vector<8x32xf32>
    %176 = arith.addf %174, %175 : vector<8x32xf32>
    %177 = math.tanh %176 : vector<8x32xf32>
    %178 = arith.mulf %173, %177 : vector<8x32xf32>
    %179 = arith.index_cast %149 : i32 to index
    %c0_51 = arith.constant 0 : index
    %180 = vector.load %arg17[%179, %c0_51] : memref<64x32xf32, #tpu.memory_space<vmem>>, vector<8x32xf32>
    tpu.vector_store %arg17[%179, %c0_51], %178 {strides = array<i32>} : memref<64x32xf32, #tpu.memory_space<vmem>>, vector<8x32xf32>,
    %c5_i32 = arith.constant 5 : i32
    %c8_i32_52 = arith.constant 8 : i32
    %181 = arith.muli %c5_i32, %c8_i32_52 : i32
    %182 = tpu.assume_multiple %181, 8 : i32
    %183 = arith.index_cast %182 : i32 to index
    %c0_53 = arith.constant 0 : index
    %184 = vector.load %arg16[%183, %c0_53] : memref<64x128xf32, #tpu.memory_space<vmem>>, vector<8x128xf32>
    %cst_54 = arith.constant dense<0.000000e+00> : vector<8x128xf32>
    %185 = tpu.matmul %178, %13, %cst_54 {dimension_numbers = #tpu.dot_dimension_numbers<[1], [0], [0], [1], [0, 0, 1, 1], [], []>} : vector<8x32xf32>, vector<32x128xf32>, vector<8x128xf32> -> vector<8x128xf32>
    %186 = arith.addf %184, %185 : vector<8x128xf32>
    %187 = vector.extract_strided_slice %186 {offsets = [0, 0], sizes = [8, 32], strides = [1, 1]} : vector<8x128xf32> to vector<8x32xf32>
    %188 = arith.negf %187 : vector<8x32xf32>
    %189 = math.exp %188 : vector<8x32xf32>
    %cst_55 = arith.constant 1.000000e+00 : f32
    %190 = vector.broadcast %cst_55 : f32 to vector<8x32xf32>
    %191 = arith.addf %190, %189 : vector<8x32xf32>
    %192 = arith.divf %190, %191 : vector<8x32xf32>
    %193 = vector.extract_strided_slice %186 {offsets = [0, 32], sizes = [8, 32], strides = [1, 1]} : vector<8x128xf32> to vector<8x32xf32>
    %194 = arith.negf %193 : vector<8x32xf32>
    %195 = math.exp %194 : vector<8x32xf32>
    %cst_56 = arith.constant 1.000000e+00 : f32
    %196 = vector.broadcast %cst_56 : f32 to vector<8x32xf32>
    %197 = arith.addf %196, %195 : vector<8x32xf32>
    %198 = arith.divf %196, %197 : vector<8x32xf32>
    %199 = vector.extract_strided_slice %186 {offsets = [0, 64], sizes = [8, 32], strides = [1, 1]} : vector<8x128xf32> to vector<8x32xf32>
    %200 = math.tanh %199 : vector<8x32xf32>
    %201 = vector.extract_strided_slice %186 {offsets = [0, 96], sizes = [8, 32], strides = [1, 1]} : vector<8x128xf32> to vector<8x32xf32>
    %202 = arith.negf %201 : vector<8x32xf32>
    %203 = math.exp %202 : vector<8x32xf32>
    %cst_57 = arith.constant 1.000000e+00 : f32
    %204 = vector.broadcast %cst_57 : f32 to vector<8x32xf32>
    %205 = arith.addf %204, %203 : vector<8x32xf32>
    %206 = arith.divf %204, %205 : vector<8x32xf32>
    %207 = arith.mulf %198, %176 : vector<8x32xf32>
    %208 = arith.mulf %192, %200 : vector<8x32xf32>
    %209 = arith.addf %207, %208 : vector<8x32xf32>
    %210 = math.tanh %209 : vector<8x32xf32>
    %211 = arith.mulf %206, %210 : vector<8x32xf32>
    %212 = arith.index_cast %182 : i32 to index
    %c0_58 = arith.constant 0 : index
    %213 = vector.load %arg17[%212, %c0_58] : memref<64x32xf32, #tpu.memory_space<vmem>>, vector<8x32xf32>
    tpu.vector_store %arg17[%212, %c0_58], %211 {strides = array<i32>} : memref<64x32xf32, #tpu.memory_space<vmem>>, vector<8x32xf32>,
    %c6_i32 = arith.constant 6 : i32
    %c8_i32_59 = arith.constant 8 : i32
    %214 = arith.muli %c6_i32, %c8_i32_59 : i32
    %215 = tpu.assume_multiple %214, 8 : i32
    %216 = arith.index_cast %215 : i32 to index
    %c0_60 = arith.constant 0 : index
    %217 = vector.load %arg16[%216, %c0_60] : memref<64x128xf32, #tpu.memory_space<vmem>>, vector<8x128xf32>
    %cst_61 = arith.constant dense<0.000000e+00> : vector<8x128xf32>
    %218 = tpu.matmul %211, %13, %cst_61 {dimension_numbers = #tpu.dot_dimension_numbers<[1], [0], [0], [1], [0, 0, 1, 1], [], []>} : vector<8x32xf32>, vector<32x128xf32>, vector<8x128xf32> -> vector<8x128xf32>
    %219 = arith.addf %217, %218 : vector<8x128xf32>
    %220 = vector.extract_strided_slice %219 {offsets = [0, 0], sizes = [8, 32], strides = [1, 1]} : vector<8x128xf32> to vector<8x32xf32>
    %221 = arith.negf %220 : vector<8x32xf32>
    %222 = math.exp %221 : vector<8x32xf32>
    %cst_62 = arith.constant 1.000000e+00 : f32
    %223 = vector.broadcast %cst_62 : f32 to vector<8x32xf32>
    %224 = arith.addf %223, %222 : vector<8x32xf32>
    %225 = arith.divf %223, %224 : vector<8x32xf32>
    %226 = vector.extract_strided_slice %219 {offsets = [0, 32], sizes = [8, 32], strides = [1, 1]} : vector<8x128xf32> to vector<8x32xf32>
    %227 = arith.negf %226 : vector<8x32xf32>
    %228 = math.exp %227 : vector<8x32xf32>
    %cst_63 = arith.constant 1.000000e+00 : f32
    %229 = vector.broadcast %cst_63 : f32 to vector<8x32xf32>
    %230 = arith.addf %229, %228 : vector<8x32xf32>
    %231 = arith.divf %229, %230 : vector<8x32xf32>
    %232 = vector.extract_strided_slice %219 {offsets = [0, 64], sizes = [8, 32], strides = [1, 1]} : vector<8x128xf32> to vector<8x32xf32>
    %233 = math.tanh %232 : vector<8x32xf32>
    %234 = vector.extract_strided_slice %219 {offsets = [0, 96], sizes = [8, 32], strides = [1, 1]} : vector<8x128xf32> to vector<8x32xf32>
    %235 = arith.negf %234 : vector<8x32xf32>
    %236 = math.exp %235 : vector<8x32xf32>
    %cst_64 = arith.constant 1.000000e+00 : f32
    %237 = vector.broadcast %cst_64 : f32 to vector<8x32xf32>
    %238 = arith.addf %237, %236 : vector<8x32xf32>
    %239 = arith.divf %237, %238 : vector<8x32xf32>
    %240 = arith.mulf %231, %209 : vector<8x32xf32>
    %241 = arith.mulf %225, %233 : vector<8x32xf32>
    %242 = arith.addf %240, %241 : vector<8x32xf32>
    %243 = math.tanh %242 : vector<8x32xf32>
    %244 = arith.mulf %239, %243 : vector<8x32xf32>
    %245 = arith.index_cast %215 : i32 to index
    %c0_65 = arith.constant 0 : index
    %246 = vector.load %arg17[%245, %c0_65] : memref<64x32xf32, #tpu.memory_space<vmem>>, vector<8x32xf32>
    tpu.vector_store %arg17[%245, %c0_65], %244 {strides = array<i32>} : memref<64x32xf32, #tpu.memory_space<vmem>>, vector<8x32xf32>,
    %c7_i32 = arith.constant 7 : i32
    %c8_i32_66 = arith.constant 8 : i32
    %247 = arith.muli %c7_i32, %c8_i32_66 : i32
    %248 = tpu.assume_multiple %247, 8 : i32
    %249 = arith.index_cast %248 : i32 to index
    %c0_67 = arith.constant 0 : index
    %250 = vector.load %arg16[%249, %c0_67] : memref<64x128xf32, #tpu.memory_space<vmem>>, vector<8x128xf32>
    %cst_68 = arith.constant dense<0.000000e+00> : vector<8x128xf32>
    %251 = tpu.matmul %244, %13, %cst_68 {dimension_numbers = #tpu.dot_dimension_numbers<[1], [0], [0], [1], [0, 0, 1, 1], [], []>} : vector<8x32xf32>, vector<32x128xf32>, vector<8x128xf32> -> vector<8x128xf32>
    %252 = arith.addf %250, %251 : vector<8x128xf32>
    %253 = vector.extract_strided_slice %252 {offsets = [0, 0], sizes = [8, 32], strides = [1, 1]} : vector<8x128xf32> to vector<8x32xf32>
    %254 = arith.negf %253 : vector<8x32xf32>
    %255 = math.exp %254 : vector<8x32xf32>
    %cst_69 = arith.constant 1.000000e+00 : f32
    %256 = vector.broadcast %cst_69 : f32 to vector<8x32xf32>
    %257 = arith.addf %256, %255 : vector<8x32xf32>
    %258 = arith.divf %256, %257 : vector<8x32xf32>
    %259 = vector.extract_strided_slice %252 {offsets = [0, 32], sizes = [8, 32], strides = [1, 1]} : vector<8x128xf32> to vector<8x32xf32>
    %260 = arith.negf %259 : vector<8x32xf32>
    %261 = math.exp %260 : vector<8x32xf32>
    %cst_70 = arith.constant 1.000000e+00 : f32
    %262 = vector.broadcast %cst_70 : f32 to vector<8x32xf32>
    %263 = arith.addf %262, %261 : vector<8x32xf32>
    %264 = arith.divf %262, %263 : vector<8x32xf32>
    %265 = vector.extract_strided_slice %252 {offsets = [0, 64], sizes = [8, 32], strides = [1, 1]} : vector<8x128xf32> to vector<8x32xf32>
    %266 = math.tanh %265 : vector<8x32xf32>
    %267 = vector.extract_strided_slice %252 {offsets = [0, 96], sizes = [8, 32], strides = [1, 1]} : vector<8x128xf32> to vector<8x32xf32>
    %268 = arith.negf %267 : vector<8x32xf32>
    %269 = math.exp %268 : vector<8x32xf32>
    %cst_71 = arith.constant 1.000000e+00 : f32
    %270 = vector.broadcast %cst_71 : f32 to vector<8x32xf32>
    %271 = arith.addf %270, %269 : vector<8x32xf32>
    %272 = arith.divf %270, %271 : vector<8x32xf32>
    %273 = arith.mulf %264, %242 : vector<8x32xf32>
    %274 = arith.mulf %258, %266 : vector<8x32xf32>
    %275 = arith.addf %273, %274 : vector<8x32xf32>
    %276 = math.tanh %275 : vector<8x32xf32>
    %277 = arith.mulf %272, %276 : vector<8x32xf32>
    %278 = arith.index_cast %248 : i32 to index
    %c0_72 = arith.constant 0 : index
    %279 = vector.load %arg17[%278, %c0_72] : memref<64x32xf32, #tpu.memory_space<vmem>>, vector<8x32xf32>
    tpu.vector_store %arg17[%278, %c0_72], %277 {strides = array<i32>} : memref<64x32xf32, #tpu.memory_space<vmem>>, vector<8x32xf32>,
    %c8_i32_73 = arith.constant 8 : i32
    %c0_74 = arith.constant 0 : index
    %c0_75 = arith.constant 0 : index
    %280 = vector.load %arg14[%c0_74, %c0_75] : memref<8x32xf32, #tpu.memory_space<vmem>>, vector<8x32xf32>
    tpu.vector_store %arg14[%c0_74, %c0_75], %277 {strides = array<i32>} : memref<8x32xf32, #tpu.memory_space<vmem>>, vector<8x32xf32>,
    %c0_76 = arith.constant 0 : index
    %c0_77 = arith.constant 0 : index
    %281 = vector.load %arg15[%c0_76, %c0_77] : memref<8x32xf32, #tpu.memory_space<vmem>>, vector<8x32xf32>
    tpu.vector_store %arg15[%c0_76, %c0_77], %275 {strides = array<i32>} : memref<8x32xf32, #tpu.memory_space<vmem>>, vector<8x32xf32>,
    %c0_78 = arith.constant 0 : index
    %c0_79 = arith.constant 0 : index
    %282 = vector.load %arg17[%c0_78, %c0_79] : memref<64x32xf32, #tpu.memory_space<vmem>>, vector<64x32xf32>
    %c0_80 = arith.constant 0 : index
    %c0_81 = arith.constant 0 : index
    %283 = vector.load %arg9[%c0_80, %c0_81] : memref<32x32xf32, #tpu.memory_space<vmem>>, vector<32x32xf32>
    %cst_82 = arith.constant dense<0.000000e+00> : vector<64x32xf32>
    %284 = tpu.matmul %282, %283, %cst_82 {dimension_numbers = #tpu.dot_dimension_numbers<[1], [0], [0], [1], [0, 0, 1, 1], [], []>} : vector<64x32xf32>, vector<32x32xf32>, vector<64x32xf32> -> vector<64x32xf32>
    %c0_83 = arith.constant 0 : index
    %c0_84 = arith.constant 0 : index
    %285 = vector.load %arg10[%c0_83, %c0_84] : memref<1x32xf32, #tpu.memory_space<vmem>>, vector<1x32xf32>
    %286 = vector.broadcast %285 : vector<1x32xf32> to vector<64x32xf32>
    %287 = arith.addf %284, %286 : vector<64x32xf32>
    %288 = math.tanh %287 : vector<64x32xf32>
    %c0_85 = arith.constant 0 : index
    %c0_86 = arith.constant 0 : index
    %289 = vector.load %arg11[%c0_85, %c0_86] : memref<32x128xf32, #tpu.memory_space<vmem>>, vector<32x128xf32>
    %cst_87 = arith.constant dense<0.000000e+00> : vector<64x128xf32>
    %290 = tpu.matmul %288, %289, %cst_87 {dimension_numbers = #tpu.dot_dimension_numbers<[1], [0], [0], [1], [0, 0, 1, 1], [], []>} : vector<64x32xf32>, vector<32x128xf32>, vector<64x128xf32> -> vector<64x128xf32>
    %c0_88 = arith.constant 0 : index
    %c0_89 = arith.constant 0 : index
    %291 = vector.load %arg12[%c0_88, %c0_89] : memref<1x128xf32, #tpu.memory_space<vmem>>, vector<1x128xf32>
    %292 = vector.broadcast %291 : vector<1x128xf32> to vector<64x128xf32>
    %293 = arith.addf %290, %292 : vector<64x128xf32>
    %294 = tpu.iota {dimensions = array<i32: 1>} : vector<64x128xi32>
    %c4_i32_90 = arith.constant 4 : i32
    %295 = vector.broadcast %c4_i32_90 : i32 to vector<64x128xi32>
    %296 = arith.cmpi slt, %294, %295 : vector<64x128xi32>
    %cst_91 = arith.constant 0xFF800000 : f32
    %297 = vector.broadcast %cst_91 : f32 to vector<64x128xf32>
    %298 = arith.select %296, %293, %297 : vector<64x128xi1>, vector<64x128xf32>
    %cst_92 = arith.constant dense<0xFF800000> : vector<64xf32>
    %299 = vector.multi_reduction <maximumf>, %298, %cst_92 [1] : vector<64x128xf32> to vector<64xf32>
    %300 = vector.shape_cast %299 : vector<64xf32> to vector<64x1xf32>
    %301 = vector.broadcast %300 : vector<64x1xf32> to vector<64x128xf32>
    %302 = arith.subf %298, %301 : vector<64x128xf32>
    %303 = math.exp %302 : vector<64x128xf32>
    %cst_93 = arith.constant dense<0.000000e+00> : vector<64xf32>
    %304 = vector.multi_reduction <add>, %303, %cst_93 [1] : vector<64x128xf32> to vector<64xf32>
    %305 = vector.shape_cast %304 : vector<64xf32> to vector<64x1xf32>
    %306 = math.log %305 : vector<64x1xf32>
    %307 = arith.addf %300, %306 : vector<64x1xf32>
    %308 = vector.broadcast %307 : vector<64x1xf32> to vector<64x128xf32>
    %309 = arith.subf %293, %308 : vector<64x128xf32>
    %310 = arith.select %296, %309, %293 : vector<64x128xi1>, vector<64x128xf32>
    %c0_94 = arith.constant 0 : index
    %c0_95 = arith.constant 0 : index
    %311 = vector.load %arg13[%c0_94, %c0_95] : memref<64x128xf32, #tpu.memory_space<vmem>>, vector<64x128xf32>
    tpu.vector_store %arg13[%c0_94, %c0_95], %310 {strides = array<i32>} : memref<64x128xf32, #tpu.memory_space<vmem>>, vector<64x128xf32>,
    return
  }
  func.func @transform_0(%arg0: i32) -> (i32, i32) {
    %c0_i32 = arith.constant 0 : i32
    %c0_i32_0 = arith.constant 0 : i32
    %c0_i32_1 = arith.constant 0 : i32
    return %c0_i32, %c0_i32_0 : i32, i32
  }
  func.func @transform_1(%arg0: i32) -> (i32, i32) {
    %c0_i32 = arith.constant 0 : i32
    %c0_i32_0 = arith.constant 0 : i32
    %c0_i32_1 = arith.constant 0 : i32
    return %c0_i32, %c0_i32_0 : i32, i32
  }
  func.func @transform_2(%arg0: i32) -> (i32, i32) {
    %c0_i32 = arith.constant 0 : i32
    %c0_i32_0 = arith.constant 0 : i32
    %c0_i32_1 = arith.constant 0 : i32
    return %c0_i32, %c0_i32_0 : i32, i32
  }
  func.func @transform_3(%arg0: i32) -> (i32, i32) {
    %c0_i32 = arith.constant 0 : i32
    %c0_i32_0 = arith.constant 0 : i32
    %c0_i32_1 = arith.constant 0 : i32
    return %c0_i32, %c0_i32_0 : i32, i32
  }
  func.func @transform_4(%arg0: i32) -> (i32, i32) {
    %c0_i32 = arith.constant 0 : i32
    %c0_i32_0 = arith.constant 0 : i32
    %c0_i32_1 = arith.constant 0 : i32
    return %c0_i32, %c0_i32_0 : i32, i32
  }
  func.func @transform_5(%arg0: i32) -> (i32, i32) {
    %c0_i32 = arith.constant 0 : i32
    %c0_i32_0 = arith.constant 0 : i32
    %c0_i32_1 = arith.constant 0 : i32
    return %c0_i32, %c0_i32_0 : i32, i32
  }
  func.func @transform_6(%arg0: i32) -> (i32, i32) {
    %c0_i32 = arith.constant 0 : i32
    %c0_i32_0 = arith.constant 0 : i32
    %c0_i32_1 = arith.constant 0 : i32
    return %c0_i32, %c0_i32_0 : i32, i32
  }
  func.func @transform_7(%arg0: i32) -> (i32, i32) {
    %c0_i32 = arith.constant 0 : i32
    %c0_i32_0 = arith.constant 0 : i32
    %c0_i32_1 = arith.constant 0 : i32
    return %c0_i32, %c0_i32_0 : i32, i32
  }
  func.func @transform_8(%arg0: i32) -> (i32, i32) {
    %c0_i32 = arith.constant 0 : i32
    %c0_i32_0 = arith.constant 0 : i32
    %c0_i32_1 = arith.constant 0 : i32
    return %c0_i32, %c0_i32_0 : i32, i32
  }
  func.func @transform_9(%arg0: i32) -> (i32, i32) {
    %c0_i32 = arith.constant 0 : i32
    %c0_i32_0 = arith.constant 0 : i32
    %c0_i32_1 = arith.constant 0 : i32
    return %c0_i32, %c0_i32_0 : i32, i32
  }
  func.func @transform_10(%arg0: i32) -> (i32, i32) {
    %c0_i32 = arith.constant 0 : i32
    %c0_i32_0 = arith.constant 0 : i32
    %c0_i32_1 = arith.constant 0 : i32
    return %c0_i32, %c0_i32_0 : i32, i32
  }
  func.func @transform_11(%arg0: i32) -> (i32, i32) {
    %c0_i32 = arith.constant 0 : i32
    %c0_i32_0 = arith.constant 0 : i32
    %c0_i32_1 = arith.constant 0 : i32
    return %c0_i32, %c0_i32_0 : i32, i32
  }
  func.func @transform_12(%arg0: i32) -> (i32, i32) {
    %c0_i32 = arith.constant 0 : i32
    %c0_i32_0 = arith.constant 0 : i32
    %c0_i32_1 = arith.constant 0 : i32
    return %c0_i32, %c0_i32_0 : i32, i32
  }
  func.func @transform_13(%arg0: i32) -> (i32, i32) {
    %c0_i32 = arith.constant 0 : i32
    %c0_i32_0 = arith.constant 0 : i32
    %c0_i32_1 = arith.constant 0 : i32
    return %c0_i32, %c0_i32_0 : i32, i32
  }
  func.func @transform_14(%arg0: i32) -> (i32, i32) {
    %c0_i32 = arith.constant 0 : i32
    %c0_i32_0 = arith.constant 0 : i32
    %c0_i32_1 = arith.constant 0 : i32
    return %c0_i32, %c0_i32_0 : i32, i32
  }
}

</mosaic_0001>

<bundles_post_ra>
// kernel: forward.1
= control target key start
LH: loop header
LB: loop body
LE: loop exit
PB: predicated region body
PF: predicated region fallthrough
CT: control target
= control target key end

     0   :  { %20 = vsyncpa [#allocation5], 0  ;;  %s1298_s16 = smov [#allocation4]   ;;  %s1299_s18 = smov 128   ;;  %s1781_s0 = inlined_call_operand.vmem [shape: f32[64,8], index: 0, kind: input, shape index: {}]   ;;  %s1782_s1 = inlined_call_operand.vmem [shape: f32[8,32], index: 1, kind: input, shape index: {}]   ;;  %s1783_s2 = inlined_call_operand.vmem [shape: f32[8,32], index: 2, kind: input, shape index: {}]   ;;  %s1784_s3 = inlined_call_operand.vmem [shape: f32[8,32], index: 3, kind: input, shape index: {}]   ;;  %s1785_s4 = inlined_call_operand.vmem [shape: f32[1,32], index: 4, kind: input, shape index: {}, may-alias: {4,9}]   ;;  %s1786_s5 = inlined_call_operand.hbm [shape: f32[32,128], index: 5, kind: input, shape index: {}]   ;;  %s1787_s6 = inlined_call_operand.vmem [shape: f32[1,128], index: 6, kind: input, shape index: {}]   ;;  %s1788_s7 = inlined_call_operand.vmem [shape: f32[32,128], index: 7, kind: input, shape index: {}]   ;;  %s1789_s8 = inlined_call_operand.vmem [shape: f32[32,32], index: 8, kind: input, shape index: {}]   ;;  %s1790_s9 = inlined_call_operand.vmem [shape: f32[1,32], index: 9, kind: input, shape index: {}, may-alias: {4,9}]   ;;  %s1791_s10 = inlined_call_operand.vmem [shape: f32[32,128], index: 10, kind: input, shape index: {}]   ;;  %s1792_s11 = inlined_call_operand.vmem [shape: f32[1,128], index: 11, kind: input, shape index: {}]   ;;  %s1793_s12 = inlined_call_operand.vmem [shape: f32[64,128], index: 12, kind: output, shape index: {0}]   ;;  %s1794_s13 = inlined_call_operand.vmem [shape: f32[8,32], index: 13, kind: output, shape index: {1}]   ;;  %s1795_s14 = inlined_call_operand.vmem [shape: f32[8,32], index: 14, kind: output, shape index: {2}]  }
   0x1   :  { %s35_s15 = sshll.u32 %s1786_s5, 4  ;;  %s37_s17 = sshll.u32 %s1298_s16, 4  ;;  %s36_s15 = int_to_ptr.hbm [resolvable:$true] %s35_s15  ;;  %s38_s17 = int_to_ptr.vmem [resolvable:$true] %s37_s17 }
   0x2   :  { %s1300_s19 = smov 8  }
   0x3   :  { %43 = dma.hbm_to_vmem [thread:$0]  %s36_s15, 512, %s38_s17, [#allocation5], %s1299_s18, %s1299_s18, %s1300_s19  }
   0x4   :  { %1296 = dma.done.wait [#allocation5], 512  }
   0x5   :  { %1297 = vsyncadd [#allocation5], 4294966784  ;;  %vm73_vm0 = vcmask 64512   ;;  %v68_v0 = vld [vmem:[%s1784_s3] sm:$0xff]  ;;  %v1391_v2 = vld [vmem:[%s1788_s7 + $0x18] sm:$0xff]  ;;  %vm155_vm1 = vcmask 261120  }
   0x6   :  { %v60_v1 = vld [vmem:[%s1781_s0] sm:$0xff]  ;;  %113 = vmatpush.msra.mxu0 %v68_v0  ;;  %251 = vmatpush.msra.mxu2 %v1391_v2  ;;  %v1399_v3 = vld [vmem:[%s1788_s7 + $0x10] sm:$0xff]  ;;  %v150_v4 = vld [vmem:[#allocation4 + $0x18] sm:$0xff]  ;;  %s1302_s20 = smov 32   ;;  %s1303_s16 = smov 96  }
   0x7   :  { %1078 = vmatmul.msk.f32.vlgmr.msra.gmra.mxu0 %vm73_vm0, %v60_v1  ;;  %322 = vmatpush.msra.mxu3 %v1391_v2  ;;  %v1406_v5 = vld [vmem:[%s1788_s7 + $0x8] sm:$0xff]  ;;  %v149_v6 = vld [vmem:[#allocation4 + $0x10] sm:$0xff]  ;;  %v1412_v7 = vld [vmem:[%s1788_s7] sm:$0xff] }
   0x8   :  { %252 = vmatpush.msra.mxu2 %v1399_v3  ;;  %192 = vmatpush.msra.mxu1 %v150_v4  ;;  %v233_v8 = vld [vmem:[%s1782_s1] sm:$0xff]  ;;  %v148_v9 = vld [vmem:[#allocation4 + $0x8] sm:$0xff]  ;;  %v62_v43 = vld [vmem:[%s1781_s0 + $0x10] sm:$0xff] }
   0x9   :  { %323 = vmatpush.msra.mxu3 %v1399_v3  ;;  %v147_v10 = vld [vmem:[#allocation4] sm:$0xff]  ;;  %v61_v37 = vld [vmem:[%s1781_s0 + $0x8] sm:$0xff]  ;;  %v63_v44 = vld [vmem:[%s1781_s0 + $0x18] sm:$0xff] }
   0xa   :  { %253 = vmatpush.msra.mxu2 %v1406_v5  ;;  %193 = vmatpush.msra.mxu1 %v149_v6  ;;  %v1436_v11 = vld [vmem:[%s1785_s4] ss:$0 sm:$0xff]  ;;  %s1301_s4 = smov 64   ;;  %v65_v49 = vld [vmem:[%s1781_s0 + $0x28] sm:$0xff]  ;;  %v66_v52 = vld [vmem:[%s1781_s0 + $0x30] sm:$0xff] }
   0xb   :  { %324 = vmatpush.msra.mxu3 %v1406_v5  ;;  %v1443_v15 = vld [vmem:[%s1787_s6] ss:$0 sm:$0xff]  ;;  %v67_v53 = vld [vmem:[%s1781_s0 + $0x38] sm:$0xff]  ;;  %v1495_v55 = vld [vmem:[%s1789_s8 + $0x10] sm:$0xff] }
   0xc   :  { %254 = vmatpush.msra.mxu2 %v1412_v7  ;;  %194 = vmatpush.msra.mxu1 %v148_v9  ;;  %v234_v21 = vld [vmem:[%s1783_s2] sm:$0xff]  ;;  %v1490_v54 = vld [vmem:[%s1789_s8 + $0x18] sm:$0xff]  ;;  %v1501_v56 = vld [vmem:[%s1789_s8 + $0x8] sm:$0xff] }
   0xd   :  { %1094 = vmatmul.msk.f32.vlgmr.msra.gmra.mxu2 %vm155_vm1, %v233_v8  ;;  %325 = vmatpush.msra.mxu3 %v1412_v7  ;;  %v64_v47 = vld [vmem:[%s1781_s0 + $0x20] sm:$0xff] }
   0xe   :  { %390 = vmatpush.msrb.mxu2 %v1391_v2  ;;  %195 = vmatpush.msra.mxu1 %v147_v10  ;;  %v1507_v57 = vld [vmem:[%s1789_s8] sm:$0xff] }
   0xf   :  { %458 = vmatpush.msrb.mxu3 %v1391_v2  ;;  %1079 = vmatmul.msk.f32.gmra.mxu0 %vm73_vm0, %v61_v37 }
  0x10   :  { %391 = vmatpush.msrb.mxu2 %v1399_v3  ;;  %840 = vmatpush.msrb.mxu0 %v1490_v54 }
  0x11   :  { %459 = vmatpush.msrb.mxu3 %v1399_v3 }
  0x12   :  { %392 = vmatpush.msrb.mxu2 %v1406_v5  ;;  %841 = vmatpush.msrb.mxu0 %v1495_v55 }
  0x13   :  { %460 = vmatpush.msrb.mxu3 %v1406_v5 }
  0x14   :  { %393 = vmatpush.msrb.mxu2 %v1412_v7  ;;  %842 = vmatpush.msrb.mxu0 %v1501_v56 }
  0x15   :  { %461 = vmatpush.msrb.mxu3 %v1412_v7 }
  0x16   :  { %526 = vmatpush.msra.mxu2 %v1391_v2  ;;  %843 = vmatpush.msrb.mxu0 %v1507_v57 }
  0x17   :  { %1080 = vmatmul.msk.f32.gmra.mxu0 %vm73_vm0, %v62_v43 }
  0x18   :  { %527 = vmatpush.msra.mxu2 %v1399_v3 }
  0x1a   :  { %528 = vmatpush.msra.mxu2 %v1406_v5 }
  0x1c   :  { %529 = vmatpush.msra.mxu2 %v1412_v7 }
  0x1f   :  { %1081 = vmatmul.msk.f32.gmra.mxu0 %vm73_vm0, %v63_v44 }
  0x27   :  { %1082 = vmatmul.msk.f32.gmra.mxu0 %vm73_vm0, %v64_v47 }
  0x2f   :  { %1083 = vmatmul.msk.f32.gmra.mxu0 %vm73_vm0, %v65_v49 }
  0x37   :  { %1084 = vmatmul.msk.f32.gmra.mxu0 %vm73_vm0, %v66_v52 }
  0x3f   :  { %1085 = vmatmul.msk.f32.gmra.mxu0 %vm73_vm0, %v67_v53 }
  0x84   :  { %v115_v12 = vpop.f32.mrf.mxu0 }
  0x85   :  { %v116_v13 = vadd.f32 %v1436_v11, %v115_v12 }
  0x87   :  { %1144 = vtanh.f32 %v116_v13 }
  0x8c   :  { %v118_v45 = vpop.f32.mrf.mxu0 }
  0x8d   :  { %v1145_v14 = vpop.eup %1144  ;;  %v119_v46 = vadd.f32 %v1436_v11, %v118_v45 }
  0x8e   :  { %1086 = vmatmul.msk.f32.vlgmr.msra.gmra.mxu1 %vm155_vm1, %v1145_v14 }
  0x90   :  { %v256_v17 = vpop.f32.mrf.mxu2 }
  0x94   :  { %v121_v59 = vpop.f32.mrf.mxu0 }
  0x95   :  { %v122_v60 = vadd.f32 %v1436_v11, %v121_v59 }
  0x9c   :  { %v124_v62 = vpop.f32.mrf.mxu0 }
  0x9d   :  { %v125_v0 = vadd.f32 %v1436_v11, %v124_v62 }
  0xa4   :  { %v127_v1 = vpop.f32.mrf.mxu0 }
  0xa5   :  { %v128_v6 = vadd.f32 %v1436_v11, %v127_v1 }
  0xac   :  { %v130_v8 = vpop.f32.mrf.mxu0 }
  0xad   :  { %v131_v10 = vadd.f32 %v1436_v11, %v130_v8 }
  0xb4   :  { %v133_v12 = vpop.f32.mrf.mxu0 }
  0xb5   :  { %v134_v14 = vadd.f32 %v1436_v11, %v133_v12 }
 0x10b   :  { %v197_v16 = vpop.f32.mrf.mxu1 }
 0x10c   :  { %v198_v18 = vadd.f32 %v1443_v15, %v197_v16 }
 0x10e   :  { %v259_v19 = vadd.f32 %v256_v17, %v198_v18  ;;  %v136_v17 = vpop.f32.mrf.mxu0 }
 0x10f   :  { %v137_v18 = vadd.f32 %v1436_v11, %v136_v17  ;;  %v1545_v11 = vld [vmem:[%s1791_s10 + $0x8] sm:$0xff] }
 0x110   :  { %1146 = vtanh.f32 %v259_v19  ;;  %v1095_v22 = vmul.f32 -1.442695, %v259_v19 }
 0x112   :  { %1148 = vpow2.f32 %v1095_v22  ;;  %v1551_v22 = vld [vmem:[%s1791_s10] sm:$0xff] }
 0x116   :  { %v1147_v20 = vpop.eup %1146 }
 0x117   :  { %286 = vrot.lane.b32.xlu0 %v1147_v20, %s1301_s4  ;;  %v1533_v20 = vld [vmem:[%s1791_s10 + $0x18] sm:$0xff] }
 0x118   :  { %v1149_v23 = vpop.eup %1148  ;;  %921 = vmatpush.msrb.mxu1 %v1533_v20 }
 0x119   :  { %v263_v24 = vadd.f32 1.0, %v1149_v23 }
 0x11b   :  { %1150 = vrcp.f32 %v263_v24  ;;  %v275_v30 = vand.u32 2147483648, %v263_v24  ;;  %vm269_vm3 = vweird.f32 %v263_v24  ;;  %v273_v31 = vand.u32 2147483647, %v263_v24 }
 0x11d   :  { %v276_v33 = vor.u32 1.1754944e-38, %v275_v30  ;;  %vm274_vm5 = vcmp.eq.f32.partialorder %v273_v31, 8.507059e+37 }
 0x11f   :  { %281 = vrot.lane.b32.xlu0 %v234_v21, %s1302_s20  ;;  %v1539_v21 = vld [vmem:[%s1791_s10 + $0x10] sm:$0xff] }
 0x120   :  { %922 = vmatpush.msrb.mxu1 %v1539_v21 }
 0x121   :  { %v1151_v25 = vpop.eup %1150 }
 0x122   :  { %v265_v26 = vmul.f32 %v1151_v25, %v263_v24  ;;  %vm270_vm2 = vweird.f32 %v1151_v25  ;;  %923 = vmatpush.msrb.mxu1 %v1545_v11 }
 0x123   :  { %vm271_vm4 = vmor %vm269_vm3, %vm270_vm2 }
 0x124   :  { %v266_v27 = vsub.f32 1.0, %v265_v26  ;;  %924 = vmatpush.msrb.mxu1 %v1551_v22 }
 0x126   :  { %v267_v28 = vmul.f32 %v1151_v25, %v266_v27 }
 0x128   :  { %v268_v29 = vadd.f32 %v1151_v25, %v267_v28 }
 0x12a   :  { %v272_v32 = vsel %vm271_vm4, %v1151_v25, %v268_v29  ;;  %v1558_v25 = vld [vmem:[%s1790_s9] ss:$0 sm:$0xff] }
 0x12b   :  { %v277_v35 = vsel %vm274_vm5, %v276_v33, %v272_v32 }
 0x189   :  { %v287_v34 = vpop.permute.xlu0 %286 }
 0x18a   :  { %v289_v36 = vmul.f32 %v287_v34, %v277_v35 }
 0x18c   :  { %291 = vrot.lane.b32.xlu1 %v289_v36, %s1302_s20 }
 0x191   :  { %v282_v38 = vpop.permute.xlu0 %281 }
 0x192   :  { %v284_v39 = vmul.f32 %v282_v38, %v277_v35 }
 0x1fe   :  { %v292_v40 = vpop.permute.xlu1 %291 }
 0x1ff   :  { %v1456_v41 = vadd.f32 %v292_v40, %v284_v39 }
 0x201   :  { %1152 = vtanh.f32 %v1456_v41 }
 0x202   :  { %1154 = vtanh.f32 %v119_v46 }
 0x203   :  { %1156 = vtanh.f32 %v122_v60 }
 0x204   :  { %1158 = vtanh.f32 %v125_v0 }
 0x205   :  { %1160 = vtanh.f32 %v128_v6 }
 0x206   :  { %1162 = vtanh.f32 %v131_v10 }
 0x207   :  { %v1153_v42 = vpop.eup %1152  ;;  %1164 = vtanh.f32 %v134_v14 }
 0x208   :  { %297 = vrot.lane.b32.xlu1 %v1153_v42, %s1301_s4  ;;  %v1155_v48 = vpop.eup %1154  ;;  %1166 = vtanh.f32 %v137_v18 }
 0x209   :  { %1087 = vmatmul.msk.f32.gmra.mxu1 %vm155_vm1, %v1155_v48  ;;  %v1157_v63 = vpop.eup %1156 }
 0x20a   :  { %v1159_v4 = vpop.eup %1158 }
 0x20b   :  { %v1161_v9 = vpop.eup %1160 }
 0x20c   :  { %v1163_v13 = vpop.eup %1162 }
 0x20d   :  { %v1165_v16 = vpop.eup %1164 }
 0x20e   :  { %v1167_v19 = vpop.eup %1166 }
 0x211   :  { %1088 = vmatmul.msk.f32.gmra.mxu1 %vm155_vm1, %v1157_v63 }
 0x219   :  { %1089 = vmatmul.msk.f32.gmra.mxu1 %vm155_vm1, %v1159_v4 }
 0x221   :  { %1090 = vmatmul.msk.f32.gmra.mxu1 %vm155_vm1, %v1161_v9 }
 0x229   :  { %1091 = vmatmul.msk.f32.gmra.mxu1 %vm155_vm1, %v1163_v13 }
 0x231   :  { %1092 = vmatmul.msk.f32.gmra.mxu1 %vm155_vm1, %v1165_v16 }
 0x239   :  { %1093 = vmatmul.msk.f32.gmra.mxu1 %vm155_vm1, %v1167_v19 }
 0x27a   :  { %v298_v50 = vpop.permute.xlu1 %297 }
 0x27b   :  { %v300_v51 = vmul.f32 %v298_v50, %v277_v35 }
 0x27d   :  { %302 = vrot.lane.b32.xlu2 %v300_v51, %s1302_s20 }
 0x286   :  { %v200_v23 = vpop.f32.mrf.mxu1 }
 0x287   :  { %v201_v24 = vadd.f32 %v1443_v15, %v200_v23 }
 0x28e   :  { %v203_v59 = vpop.f32.mrf.mxu1 }
 0x28f   :  { %v204_v60 = vadd.f32 %v1443_v15, %v203_v59 }
 0x2d7   :  { %v303_v58 = vpop.permute.xlu2 %302 }
 0x2d8   :  { %305 = vst.msk [vmem:[#allocation3] sm:$0xff] %vm155_vm1, %v303_v58  ;;  %1096 = vmatmul.msk.f32.vlgmr.msra.gmra.mxu3 %vm155_vm1, %v303_v58 }
 0x2d9   :  { %594 = vmatpush.msra.mxu3 %v1391_v2 }
 0x2db   :  { %595 = vmatpush.msra.mxu3 %v1399_v3 }
 0x2dd   :  { %596 = vmatpush.msra.mxu3 %v1406_v5 }
 0x2df   :  { %v788_v61 = vld [vmem:[#allocation3] sm:$0xff]  ;;  %597 = vmatpush.msra.mxu3 %v1412_v7 }
 0x2e0   :  { %1110 = vmatmul.msk.f32.vlgmr.msrb.gmra.mxu0 %vm155_vm1, %v788_v61 }
 0x35b   :  { %v327_v26 = vpop.f32.mrf.mxu3 }
 0x35c   :  { %v330_v27 = vadd.f32 %v327_v26, %v201_v24 }
 0x35d   :  { %v845_v28 = vpop.f32.mrf.mxu0 }
 0x35e   :  { %1168 = vtanh.f32 %v330_v27  ;;  %v846_v29 = vadd.f32 %v1558_v25, %v845_v28  ;;  %v1097_v32 = vmul.f32 -1.442695, %v330_v27 }
 0x360   :  { %1170 = vtanh.f32 %v846_v29 }
 0x361   :  { %1172 = vpow2.f32 %v1097_v32 }
 0x364   :  { %v1169_v30 = vpop.eup %1168 }
 0x365   :  { %353 = vrot.lane.b32.xlu2 %v1169_v30, %s1301_s4 }
 0x366   :  { %v1171_v31 = vpop.eup %1170 }
 0x367   :  { %1118 = vmatmul.msk.f32.vlgmr.msrb.gmra.mxu1 %vm155_vm1, %v1171_v31  ;;  %v1173_v33 = vpop.eup %1172 }
 0x368   :  { %v334_v34 = vadd.f32 1.0, %v1173_v33 }
 0x36a   :  { %1174 = vrcp.f32 %v334_v34  ;;  %v346_v40 = vand.u32 2147483648, %v334_v34  ;;  %vm340_vm7 = vweird.f32 %v334_v34  ;;  %v344_v42 = vand.u32 2147483647, %v334_v34 }
 0x36c   :  { %v347_v44 = vor.u32 1.1754944e-38, %v346_v40  ;;  %vm345_vm9 = vcmp.eq.f32.partialorder %v344_v42, 8.507059e+37 }
 0x370   :  { %v1175_v35 = vpop.eup %1174 }
 0x371   :  { %v336_v36 = vmul.f32 %v1175_v35, %v334_v34  ;;  %vm341_vm6 = vweird.f32 %v1175_v35 }
 0x372   :  { %vm342_vm8 = vmor %vm340_vm7, %vm341_vm6 }
 0x373   :  { %v337_v37 = vsub.f32 1.0, %v336_v36 }
 0x375   :  { %v338_v38 = vmul.f32 %v1175_v35, %v337_v37 }
 0x377   :  { %v339_v39 = vadd.f32 %v1175_v35, %v338_v38 }
 0x379   :  { %v343_v43 = vsel %vm342_vm8, %v1175_v35, %v339_v39  ;;  %v206_v35 = vpop.f32.mrf.mxu1 }
 0x37a   :  { %v348_v46 = vsel %vm345_vm9, %v347_v44, %v343_v43  ;;  %v207_v36 = vadd.f32 %v1443_v15, %v206_v35 }
 0x37b   :  { %v351_v48 = vmul.f32 %v348_v46, %v1456_v41 }
 0x3bf   :  { %v354_v45 = vpop.permute.xlu2 %353 }
 0x3c0   :  { %v356_v47 = vmul.f32 %v354_v45, %v348_v46 }
 0x3c2   :  { %358 = vrot.lane.b32.xlu0 %v356_v47, %s1302_s20 }
 0x434   :  { %v359_v49 = vpop.permute.xlu0 %358 }
 0x435   :  { %v361_v50 = vadd.f32 %v359_v49, %v351_v48 }
 0x437   :  { %1176 = vtanh.f32 %v361_v50 }
 0x43d   :  { %v1177_v51 = vpop.eup %1176 }
 0x43e   :  { %364 = vrot.lane.b32.xlu1 %v1177_v51, %s1301_s4 }
 0x4b0   :  { %v365_v52 = vpop.permute.xlu1 %364 }
 0x4b1   :  { %v367_v53 = vmul.f32 %v365_v52, %v348_v46 }
 0x4b3   :  { %369 = vrot.lane.b32.xlu2 %v367_v53, %s1302_s20 }
 0x50d   :  { %v370_v58 = vpop.permute.xlu2 %369 }
 0x50e   :  { %373 = vst.msk [vmem:[#allocation3 + $0x8] sm:$0xff] %vm155_vm1, %v370_v58  ;;  %1098 = vmatmul.msk.f32.vlgmr.msrb.gmra.mxu2 %vm155_vm1, %v370_v58 }
 0x50f   :  { %662 = vmatpush.msrb.mxu2 %v1391_v2 }
 0x511   :  { %663 = vmatpush.msrb.mxu2 %v1399_v3 }
 0x513   :  { %664 = vmatpush.msrb.mxu2 %v1406_v5 }
 0x515   :  { %v789_v41 = vld [vmem:[#allocation3 + $0x8] sm:$0xff]  ;;  %665 = vmatpush.msrb.mxu2 %v1412_v7 }
 0x516   :  { %1111 = vmatmul.msk.f32.gmra.mxu0 %vm155_vm1, %v789_v41 }
 0x591   :  { %v395_v61 = vpop.f32.mrf.mxu2 }
 0x592   :  { %v398_v62 = vadd.f32 %v395_v61, %v204_v60 }
 0x593   :  { %v848_v63 = vpop.f32.mrf.mxu0 }
 0x594   :  { %1178 = vtanh.f32 %v398_v62  ;;  %v849_v0 = vadd.f32 %v1558_v25, %v848_v63  ;;  %v1099_v6 = vmul.f32 -1.442695, %v398_v62  ;;  %v209_v62 = vpop.f32.mrf.mxu1 }
 0x595   :  { %v210_v63 = vadd.f32 %v1443_v15, %v209_v62 }
 0x596   :  { %1180 = vtanh.f32 %v849_v0 }
 0x597   :  { %1182 = vpow2.f32 %v1099_v6 }
 0x59a   :  { %v1179_v1 = vpop.eup %1178 }
 0x59b   :  { %421 = vrot.lane.b32.xlu0 %v1179_v1, %s1301_s4 }
 0x59c   :  { %v1181_v4 = vpop.eup %1180 }
 0x59d   :  { %1119 = vmatmul.msk.f32.gmra.mxu1 %vm155_vm1, %v1181_v4  ;;  %v1183_v8 = vpop.eup %1182 }
 0x59e   :  { %v402_v9 = vadd.f32 1.0, %v1183_v8 }
 0x5a0   :  { %1184 = vrcp.f32 %v402_v9  ;;  %v414_v17 = vand.u32 2147483648, %v402_v9  ;;  %vm408_vm11 = vweird.f32 %v402_v9  ;;  %v412_v18 = vand.u32 2147483647, %v402_v9 }
 0x5a2   :  { %v415_v23 = vor.u32 1.1754944e-38, %v414_v17  ;;  %vm413_vm13 = vcmp.eq.f32.partialorder %v412_v18, 8.507059e+37 }
 0x5a6   :  { %v1185_v10 = vpop.eup %1184 }
 0x5a7   :  { %v404_v12 = vmul.f32 %v1185_v10, %v402_v9  ;;  %vm409_vm10 = vweird.f32 %v1185_v10 }
 0x5a8   :  { %vm410_vm12 = vmor %vm408_vm11, %vm409_vm10 }
 0x5a9   :  { %v405_v13 = vsub.f32 1.0, %v404_v12 }
 0x5ab   :  { %v406_v14 = vmul.f32 %v1185_v10, %v405_v13 }
 0x5ad   :  { %v407_v16 = vadd.f32 %v1185_v10, %v406_v14 }
 0x5af   :  { %v411_v19 = vsel %vm410_vm12, %v1185_v10, %v407_v16 }
 0x5b0   :  { %v416_v26 = vsel %vm413_vm13, %v415_v23, %v411_v19 }
 0x5b1   :  { %v419_v28 = vmul.f32 %v416_v26, %v361_v50 }
 0x60d   :  { %v422_v24 = vpop.permute.xlu0 %421 }
 0x60e   :  { %v424_v27 = vmul.f32 %v422_v24, %v416_v26 }
 0x610   :  { %426 = vrot.lane.b32.xlu1 %v424_v27, %s1302_s20 }
 0x682   :  { %v427_v29 = vpop.permute.xlu1 %426 }
 0x683   :  { %v429_v30 = vadd.f32 %v427_v29, %v419_v28 }
 0x685   :  { %1186 = vtanh.f32 %v429_v30 }
 0x68b   :  { %v1187_v31 = vpop.eup %1186 }
 0x68c   :  { %432 = vrot.lane.b32.xlu2 %v1187_v31, %s1301_s4  ;;  %v212_v31 = vpop.f32.mrf.mxu1 }
 0x6e6   :  { %v433_v32 = vpop.permute.xlu2 %432 }
 0x6e7   :  { %v435_v33 = vmul.f32 %v433_v32, %v416_v26  ;;  %v213_v32 = vadd.f32 %v1443_v15, %v212_v31 }
 0x6e9   :  { %437 = vrot.lane.b32.xlu0 %v435_v33, %s1302_s20 }
 0x75b   :  { %v438_v34 = vpop.permute.xlu0 %437 }
 0x75c   :  { %441 = vst.msk [vmem:[#allocation3 + $0x10] sm:$0xff] %vm155_vm1, %v438_v34  ;;  %1100 = vmatmul.msk.f32.vlgmr.msrb.gmra.mxu3 %vm155_vm1, %v438_v34 }
 0x75d   :  { %730 = vmatpush.msrb.mxu3 %v1391_v2 }
 0x75f   :  { %731 = vmatpush.msrb.mxu3 %v1399_v3 }
 0x761   :  { %732 = vmatpush.msrb.mxu3 %v1406_v5 }
 0x763   :  { %733 = vmatpush.msrb.mxu3 %v1412_v7 }
 0x7df   :  { %v463_v37 = vpop.f32.mrf.mxu3 }
 0x7e0   :  { %v466_v38 = vadd.f32 %v463_v37, %v207_v36 }
 0x7e2   :  { %1188 = vtanh.f32 %v466_v38  ;;  %v1101_v40 = vmul.f32 -1.442695, %v466_v38 }
 0x7e4   :  { %1190 = vpow2.f32 %v1101_v40 }
 0x7e8   :  { %v1189_v39 = vpop.eup %1188 }
 0x7e9   :  { %489 = vrot.lane.b32.xlu1 %v1189_v39, %s1301_s4 }
 0x7ea   :  { %v1191_v42 = vpop.eup %1190 }
 0x7eb   :  { %v470_v43 = vadd.f32 1.0, %v1191_v42 }
 0x7ed   :  { %1192 = vrcp.f32 %v470_v43  ;;  %v482_v7 = vand.u32 2147483648, %v470_v43  ;;  %vm476_vm15 = vweird.f32 %v470_v43  ;;  %v480_v46 = vand.u32 2147483647, %v470_v43 }
 0x7ef   :  { %v483_v48 = vor.u32 1.1754944e-38, %v482_v7  ;;  %vm481_vm2 = vcmp.eq.f32.partialorder %v480_v46, 8.507059e+37 }
 0x7f3   :  { %v1193_v2 = vpop.eup %1192 }
 0x7f4   :  { %v472_v3 = vmul.f32 %v1193_v2, %v470_v43  ;;  %vm477_vm14 = vweird.f32 %v1193_v2 }
 0x7f5   :  { %vm478_vm0 = vmor %vm476_vm15, %vm477_vm14 }
 0x7f6   :  { %v473_v44 = vsub.f32 1.0, %v472_v3 }
 0x7f8   :  { %v474_v5 = vmul.f32 %v1193_v2, %v473_v44 }
 0x7fa   :  { %v475_v45 = vadd.f32 %v1193_v2, %v474_v5 }
 0x7fc   :  { %v479_v47 = vsel %vm478_vm0, %v1193_v2, %v475_v45 }
 0x7fd   :  { %v484_v50 = vsel %vm481_vm2, %v483_v48, %v479_v47 }
 0x7fe   :  { %v487_v52 = vmul.f32 %v484_v50, %v429_v30 }
 0x85b   :  { %v490_v49 = vpop.permute.xlu1 %489 }
 0x85c   :  { %v492_v51 = vmul.f32 %v490_v49, %v484_v50 }
 0x85e   :  { %494 = vrot.lane.b32.xlu2 %v492_v51, %s1302_s20  ;;  %v790_v51 = vld [vmem:[#allocation3 + $0x10] sm:$0xff] }
 0x8b8   :  { %v495_v53 = vpop.permute.xlu2 %494 }
 0x8b9   :  { %v497_v58 = vadd.f32 %v495_v53, %v487_v52 }
 0x8bb   :  { %1194 = vtanh.f32 %v497_v58 }
 0x8c1   :  { %v1195_v41 = vpop.eup %1194 }
 0x8c2   :  { %500 = vrot.lane.b32.xlu0 %v1195_v41, %s1301_s4  ;;  %v215_v41 = vpop.f32.mrf.mxu1 }
 0x934   :  { %v501_v59 = vpop.permute.xlu0 %500 }
 0x935   :  { %v503_v60 = vmul.f32 %v501_v59, %v484_v50  ;;  %v216_v59 = vadd.f32 %v1443_v15, %v215_v41 }
 0x937   :  { %505 = vrot.lane.b32.xlu1 %v503_v60, %s1302_s20 }
 0x9a9   :  { %v506_v61 = vpop.permute.xlu1 %505 }
 0x9aa   :  { %509 = vst.msk [vmem:[#allocation3 + $0x18] sm:$0xff] %vm155_vm1, %v506_v61  ;;  %1102 = vmatmul.msk.f32.vlgmr.msra.gmra.mxu2 %vm155_vm1, %v506_v61 }
 0x9ab   :  { %1126 = vmatpush.msra.mxu2 %v1490_v54 }
 0x9ad   :  { %1127 = vmatpush.msra.mxu2 %v1495_v55 }
 0x9af   :  { %1128 = vmatpush.msra.mxu2 %v1501_v56 }
 0x9b1   :  { %1129 = vmatpush.msra.mxu2 %v1507_v57  ;;  %v791_v52 = vld [vmem:[#allocation3 + $0x18] sm:$0xff] }
 0xa2d   :  { %v531_v0 = vpop.f32.mrf.mxu2 }
 0xa2e   :  { %v534_v1 = vadd.f32 %v531_v0, %v210_v63 }
 0xa30   :  { %1196 = vtanh.f32 %v534_v1  ;;  %v1103_v6 = vmul.f32 -1.442695, %v534_v1 }
 0xa32   :  { %1198 = vpow2.f32 %v1103_v6 }
 0xa36   :  { %v1197_v4 = vpop.eup %1196 }
 0xa37   :  { %557 = vrot.lane.b32.xlu2 %v1197_v4, %s1301_s4 }
 0xa38   :  { %v1199_v8 = vpop.eup %1198 }
 0xa39   :  { %v538_v9 = vadd.f32 1.0, %v1199_v8 }
 0xa3b   :  { %1200 = vrcp.f32 %v538_v9  ;;  %v550_v57 = vand.u32 2147483648, %v538_v9  ;;  %vm544_vm4 = vweird.f32 %v538_v9  ;;  %v548_v13 = vand.u32 2147483647, %v538_v9 }
 0xa3d   :  { %v551_v16 = vor.u32 1.1754944e-38, %v550_v57  ;;  %vm549_vm6 = vcmp.eq.f32.partialorder %v548_v13, 8.507059e+37 }
 0xa41   :  { %v1201_v54 = vpop.eup %1200 }
 0xa42   :  { %v540_v55 = vmul.f32 %v1201_v54, %v538_v9  ;;  %vm545_vm3 = vweird.f32 %v1201_v54 }
 0xa43   :  { %vm546_vm5 = vmor %vm544_vm4, %vm545_vm3 }
 0xa44   :  { %v541_v10 = vsub.f32 1.0, %v540_v55 }
 0xa46   :  { %v542_v56 = vmul.f32 %v1201_v54, %v541_v10 }
 0xa48   :  { %v543_v12 = vadd.f32 %v1201_v54, %v542_v56 }
 0xa4a   :  { %v547_v14 = vsel %vm546_vm5, %v1201_v54, %v543_v12 }
 0xa4b   :  { %v552_v18 = vsel %vm549_vm6, %v551_v16, %v547_v14 }
 0xa4c   :  { %v555_v23 = vmul.f32 %v552_v18, %v497_v58 }
 0xa91   :  { %v558_v17 = vpop.permute.xlu2 %557 }
 0xa92   :  { %v560_v19 = vmul.f32 %v558_v17, %v552_v18 }
 0xa94   :  { %562 = vrot.lane.b32.xlu0 %v560_v19, %s1302_s20 }
 0xb06   :  { %v563_v24 = vpop.permute.xlu0 %562 }
 0xb07   :  { %v565_v26 = vadd.f32 %v563_v24, %v555_v23 }
 0xb09   :  { %1202 = vtanh.f32 %v565_v26 }
 0xb0f   :  { %v1203_v27 = vpop.eup %1202 }
 0xb10   :  { %568 = vrot.lane.b32.xlu1 %v1203_v27, %s1301_s4 }
 0xb82   :  { %v569_v28 = vpop.permute.xlu1 %568 }
 0xb83   :  { %v571_v29 = vmul.f32 %v569_v28, %v552_v18 }
 0xb85   :  { %573 = vrot.lane.b32.xlu2 %v571_v29, %s1302_s20 }
 0xbdf   :  { %v574_v30 = vpop.permute.xlu2 %573 }
 0xbe0   :  { %577 = vst.msk [vmem:[#allocation3 + $0x20] sm:$0xff] %vm155_vm1, %v574_v30  ;;  %1104 = vmatmul.msk.f32.vlgmr.msra.gmra.mxu3 %vm155_vm1, %v574_v30 }
 0xbe1   :  { %1130 = vmatpush.msra.mxu3 %v1533_v20 }
 0xbe3   :  { %1131 = vmatpush.msra.mxu3 %v1539_v21 }
 0xbe5   :  { %1132 = vmatpush.msra.mxu3 %v1545_v11 }
 0xbe7   :  { %1133 = vmatpush.msra.mxu3 %v1551_v22  ;;  %v792_v53 = vld [vmem:[#allocation3 + $0x20] sm:$0xff] }
 0xc63   :  { %v599_v33 = vpop.f32.mrf.mxu3 }
 0xc64   :  { %v602_v34 = vadd.f32 %v599_v33, %v213_v32 }
 0xc66   :  { %1204 = vtanh.f32 %v602_v34  ;;  %v1105_v36 = vmul.f32 -1.442695, %v602_v34 }
 0xc68   :  { %1206 = vpow2.f32 %v1105_v36 }
 0xc6c   :  { %v1205_v35 = vpop.eup %1204 }
 0xc6d   :  { %625 = vrot.lane.b32.xlu0 %v1205_v35, %s1301_s4 }
 0xc6e   :  { %v1207_v37 = vpop.eup %1206 }
 0xc6f   :  { %v606_v38 = vadd.f32 1.0, %v1207_v37 }
 0xc71   :  { %1208 = vrcp.f32 %v606_v38  ;;  %v618_v22 = vand.u32 2147483648, %v606_v38  ;;  %vm612_vm8 = vweird.f32 %v606_v38  ;;  %v616_v42 = vand.u32 2147483647, %v606_v38 }
 0xc73   :  { %v619_v2 = vor.u32 1.1754944e-38, %v618_v22  ;;  %vm617_vm10 = vcmp.eq.f32.partialorder %v616_v42, 8.507059e+37 }
 0xc77   :  { %v1209_v20 = vpop.eup %1208 }
 0xc78   :  { %v608_v21 = vmul.f32 %v1209_v20, %v606_v38  ;;  %vm613_vm7 = vweird.f32 %v1209_v20 }
 0xc79   :  { %vm614_vm9 = vmor %vm612_vm8, %vm613_vm7 }
 0xc7a   :  { %v609_v39 = vsub.f32 1.0, %v608_v21  ;;  %v218_v21 = vpop.f32.mrf.mxu1 }
 0xc7c   :  { %v610_v11 = vmul.f32 %v1209_v20, %v609_v39  ;;  %v219_v39 = vadd.f32 %v1443_v15, %v218_v21 }
 0xc7e   :  { %v611_v40 = vadd.f32 %v1209_v20, %v610_v11 }
 0xc80   :  { %v615_v43 = vsel %vm614_vm9, %v1209_v20, %v611_v40 }
 0xc81   :  { %v620_v44 = vsel %vm617_vm10, %v619_v2, %v615_v43 }
 0xc82   :  { %v623_v45 = vmul.f32 %v620_v44, %v565_v26 }
 0xcdf   :  { %v626_v3 = vpop.permute.xlu0 %625 }
 0xce0   :  { %v628_v5 = vmul.f32 %v626_v3, %v620_v44 }
 0xce2   :  { %630 = vrot.lane.b32.xlu1 %v628_v5, %s1302_s20 }
 0xd54   :  { %v631_v7 = vpop.permute.xlu1 %630 }
 0xd55   :  { %v633_v46 = vadd.f32 %v631_v7, %v623_v45 }
 0xd57   :  { %1210 = vtanh.f32 %v633_v46 }
 0xd5d   :  { %v1211_v47 = vpop.eup %1210 }
 0xd5e   :  { %636 = vrot.lane.b32.xlu2 %v1211_v47, %s1301_s4 }
 0xdb8   :  { %v637_v48 = vpop.permute.xlu2 %636 }
 0xdb9   :  { %v639_v49 = vmul.f32 %v637_v48, %v620_v44 }
 0xdbb   :  { %641 = vrot.lane.b32.xlu0 %v639_v49, %s1302_s20 }
 0xe2d   :  { %v642_v50 = vpop.permute.xlu0 %641 }
 0xe2e   :  { %645 = vst.msk [vmem:[#allocation3 + $0x28] sm:$0xff] %vm155_vm1, %v642_v50  ;;  %1106 = vmatmul.msk.f32.vlgmr.msrb.gmra.mxu2 %vm155_vm1, %v642_v50 }
 0xe35   :  { %v793_v58 = vld [vmem:[#allocation3 + $0x28] sm:$0xff] }
 0xe36   :  { %1112 = vmatmul.msk.f32.vlgmr.msra.gmra.mxu2 %vm155_vm1, %v790_v51 }
 0xe3e   :  { %1113 = vmatmul.msk.f32.gmra.mxu2 %vm155_vm1, %v791_v52 }
 0xe46   :  { %1114 = vmatmul.msk.f32.gmra.mxu2 %vm155_vm1, %v792_v53 }
 0xe4e   :  { %1115 = vmatmul.msk.f32.gmra.mxu2 %vm155_vm1, %v793_v58 }
 0xeb1   :  { %v667_v60 = vpop.f32.mrf.mxu2 }
 0xeb2   :  { %v670_v61 = vadd.f32 %v667_v60, %v216_v59  ;;  %v950_v59 = vlaneseq }
 0xeb4   :  { %1212 = vtanh.f32 %v670_v61  ;;  %v1107_v63 = vmul.f32 -1.442695, %v670_v61  ;;  %v1647_v61 = vld [vmem:[%s1792_s11] ss:$0 sm:$0xff] }
 0xeb6   :  { %1214 = vpow2.f32 %v1107_v63  ;;  %v1649_v63 = vand.u32 127, %v950_v59 }
 0xeb8   :  { %vm952_vm4 = vcmp.lt.s32.totalorder %v1649_v63, 4 }
 0xeb9   :  { %v851_v26 = vpop.f32.mrf.mxu2 }
 0xeba   :  { %v1213_v62 = vpop.eup %1212  ;;  %v852_v27 = vadd.f32 %v1558_v25, %v851_v26 }
 0xebb   :  { %693 = vrot.lane.b32.xlu1 %v1213_v62, %s1301_s4  ;;  %v926_v62 = vpop.f32.mrf.mxu1 }
 0xebc   :  { %v1215_v0 = vpop.eup %1214 }
 0xebd   :  { %v674_v1 = vadd.f32 1.0, %v1215_v0  ;;  %v927_v0 = vadd.f32 %v1647_v61, %v926_v62 }
 0xebf   :  { %1216 = vrcp.f32 %v674_v1  ;;  %v686_v55 = vand.u32 2147483648, %v674_v1  ;;  %vm680_vm12 = vweird.f32 %v674_v1  ;;  %v684_v10 = vand.u32 2147483647, %v674_v1 }
 0xec1   :  { %v687_v12 = vor.u32 1.1754944e-38, %v686_v55  ;;  %vm685_vm14 = vcmp.eq.f32.partialorder %v684_v10, 8.507059e+37  ;;  %v854_v28 = vpop.f32.mrf.mxu2 }
 0xec2   :  { %v855_v30 = vadd.f32 %v1558_v25, %v854_v28 }
 0xec5   :  { %v1217_v4 = vpop.eup %1216 }
 0xec6   :  { %v676_v6 = vmul.f32 %v1217_v4, %v674_v1  ;;  %vm681_vm11 = vweird.f32 %v1217_v4  ;;  %v953_v1 = vsel %vm952_vm4, %v927_v0, -inf }
 0xec7   :  { %vm682_vm13 = vmor %vm680_vm12, %vm681_vm11 }
 0xec8   :  { %v677_v8 = vsub.f32 1.0, %v676_v6 }
 0xec9   :  { %v857_v33 = vpop.f32.mrf.mxu2 }
 0xeca   :  { %v678_v9 = vmul.f32 %v1217_v4, %v677_v8  ;;  %v858_v34 = vadd.f32 %v1558_v25, %v857_v33 }
 0xecc   :  { %v679_v54 = vadd.f32 %v1217_v4, %v678_v9 }
 0xece   :  { %v683_v56 = vsel %vm682_vm13, %v1217_v4, %v679_v54 }
 0xecf   :  { %v688_v13 = vsel %vm685_vm14, %v687_v12, %v683_v56  ;;  %v929_v56 = vpop.f32.mrf.mxu1 }
 0xed0   :  { %v691_v16 = vmul.f32 %v688_v13, %v633_v46  ;;  %v1667_v12 = vadd.f32 %v1647_v61, %v929_v56 }
 0xed1   :  { %v860_v36 = vpop.f32.mrf.mxu2 }
 0xed2   :  { %v861_v37 = vadd.f32 %v1558_v25, %v860_v36 }
 0xf2d   :  { %v694_v57 = vpop.permute.xlu1 %693 }
 0xf2e   :  { %v696_v14 = vmul.f32 %v694_v57, %v688_v13 }
 0xf30   :  { %698 = vrot.lane.b32.xlu2 %v696_v14, %s1302_s20 }
 0xf8a   :  { %v699_v17 = vpop.permute.xlu2 %698 }
 0xf8b   :  { %v1623_v18 = vadd.f32 %v699_v17, %v691_v16 }
 0xf8d   :  { %1218 = vtanh.f32 %v1623_v18 }
 0xf8e   :  { %1220 = vtanh.f32 %v852_v27 }
 0xf8f   :  { %1222 = vtanh.f32 %v855_v30 }
 0xf90   :  { %1224 = vtanh.f32 %v858_v34 }
 0xf91   :  { %1226 = vtanh.f32 %v861_v37 }
 0xf93   :  { %v1219_v19 = vpop.eup %1218 }
 0xf94   :  { %704 = vrot.lane.b32.xlu0 %v1219_v19, %s1301_s4  ;;  %v1221_v31 = vpop.eup %1220 }
 0xf95   :  { %v1223_v35 = vpop.eup %1222 }
 0xf96   :  { %v1225_v38 = vpop.eup %1224 }
 0xf97   :  { %v1227_v20 = vpop.eup %1226 }
0x1006   :  { %v705_v23 = vpop.permute.xlu0 %704 }
0x1007   :  { %v707_v24 = vmul.f32 %v705_v23, %v688_v13  ;;  %v954_v13 = vsel %vm952_vm4, %v1667_v12, -inf }
0x1009   :  { %709 = vrot.lane.b32.xlu1 %v707_v24, %s1302_s20 }
0x107b   :  { %v710_v29 = vpop.permute.xlu1 %709 }
0x107c   :  { %713 = vst.msk [vmem:[#allocation3 + $0x30] sm:$0xff] %vm155_vm1, %v710_v29  ;;  %1108 = vmatmul.msk.f32.vlgmr.msrb.gmra.mxu3 %vm155_vm1, %v710_v29 }
0x1083   :  { %v794_v32 = vld [vmem:[#allocation3 + $0x30] sm:$0xff] }
0x1084   :  { %1116 = vmatmul.msk.f32.gmra.mxu2 %vm155_vm1, %v794_v32  ;;  %1120 = vmatmul.msk.f32.vlgmr.msra.gmra.mxu3 %vm155_vm1, %v1221_v31 }
0x108c   :  { %1121 = vmatmul.msk.f32.gmra.mxu3 %vm155_vm1, %v1223_v35 }
0x1094   :  { %1122 = vmatmul.msk.f32.gmra.mxu3 %vm155_vm1, %v1225_v38 }
0x109c   :  { %1123 = vmatmul.msk.f32.gmra.mxu3 %vm155_vm1, %v1227_v20 }
0x10ff   :  { %v735_v11 = vpop.f32.mrf.mxu3 }
0x1100   :  { %v738_v40 = vadd.f32 %v735_v11, %v219_v39 }
0x1102   :  { %1228 = vtanh.f32 %v738_v40  ;;  %v1109_v3 = vmul.f32 -1.442695, %v738_v40 }
0x1107   :  { %v863_v22 = vpop.f32.mrf.mxu2  ;;  %v932_v41 = vpop.f32.mrf.mxu3 }
0x1108   :  { %v1229_v42 = vpop.eup %1228  ;;  %v864_v43 = vadd.f32 %v1558_v25, %v863_v22  ;;  %v1683_v27 = vadd.f32 %v1647_v61, %v932_v41 }
0x1109   :  { %761 = vrot.lane.b32.xlu2 %v1229_v42, %s1301_s4 }
0x110a   :  { %1230 = vtanh.f32 %v864_v43  ;;  %v1688_v29 = vsel %vm952_vm4, %v1683_v27, -inf }
0x110b   :  { %1232 = vpow2.f32 %v1109_v3 }
0x110f   :  { %v935_v60 = vpop.f32.mrf.mxu3 }
0x1110   :  { %v1231_v2 = vpop.eup %1230  ;;  %v1692_v30 = vadd.f32 %v1647_v61, %v935_v60 }
0x1111   :  { %1124 = vmatmul.msk.f32.gmra.mxu3 %vm155_vm1, %v1231_v2  ;;  %v1233_v44 = vpop.eup %1232 }
0x1112   :  { %v742_v5 = vadd.f32 1.0, %v1233_v44  ;;  %v956_v32 = vsel %vm952_vm4, %v1692_v30, -inf }
0x1114   :  { %1234 = vrcp.f32 %v742_v5  ;;  %v754_v48 = vand.u32 2147483648, %v742_v5  ;;  %vm748_vm0 = vweird.f32 %v742_v5  ;;  %v752_v49 = vand.u32 2147483647, %v742_v5 }
0x1116   :  { %v755_v51 = vor.u32 1.1754944e-38, %v754_v48  ;;  %vm753_vm3 = vcmp.eq.f32.partialorder %v752_v49, 8.507059e+37 }
0x1117   :  { %v938_v4 = vpop.f32.mrf.mxu3 }
0x1118   :  { %v1656_v6 = vadd.f32 %v1647_v61, %v938_v4 }
0x111a   :  { %v1235_v45 = vpop.eup %1234  ;;  %v957_v8 = vsel %vm952_vm4, %v1656_v6, -inf }
0x111b   :  { %v744_v15 = vmul.f32 %v1235_v45, %v742_v5  ;;  %vm749_vm15 = vweird.f32 %v1235_v45 }
0x111c   :  { %vm750_vm2 = vmor %vm748_vm0, %vm749_vm15 }
0x111d   :  { %v745_v7 = vsub.f32 1.0, %v744_v15 }
0x111f   :  { %v746_v46 = vmul.f32 %v1235_v45, %v745_v7  ;;  %v941_v14 = vpop.f32.mrf.mxu3 }
0x1120   :  { %v1673_v17 = vadd.f32 %v1647_v61, %v941_v14 }
0x1121   :  { %v747_v47 = vadd.f32 %v1235_v45, %v746_v46 }
0x1122   :  { %v1678_v19 = vsel %vm952_vm4, %v1673_v17, -inf }
0x1123   :  { %v751_v50 = vsel %vm750_vm2, %v1235_v45, %v747_v47 }
0x1124   :  { %v756_v53 = vsel %vm753_vm3, %v755_v51, %v751_v50 }
0x1125   :  { %v759_v9 = vmul.f32 %v756_v53, %v1623_v18 }
0x1163   :  { %v762_v52 = vpop.permute.xlu2 %761 }
0x1164   :  { %v764_v58 = vmul.f32 %v762_v52, %v756_v53 }
0x1166   :  { %766 = vrot.lane.b32.xlu0 %v764_v58, %s1302_s20 }
0x1190   :  { %961 = vmax.xlane.f32.xlu0 %v953_v1 }
0x1194   :  { %v944_v33 = vpop.f32.mrf.mxu3 }
0x1195   :  { %v1700_v35 = vadd.f32 %v1647_v61, %v944_v33 }
0x1197   :  { %v959_v20 = vsel %vm952_vm4, %v1700_v35, -inf }
0x1198   :  { %969 = vmax.xlane.f32.xlu0 %v957_v8 }
0x11d8   :  { %v767_v54 = vpop.permute.xlu0 %766 }
0x11d9   :  { %v1662_v55 = vadd.f32 %v767_v54, %v759_v9 }
0x11db   :  { %1236 = vtanh.f32 %v1662_v55 }
0x11e1   :  { %v1237_v10 = vpop.eup %1236 }
0x11e2   :  { %772 = vrot.lane.b32.xlu1 %v1237_v10, %s1301_s4 }
0x1203   :  { %v962_v57 = vpop.xlane.xlu0 %961 }
0x1204   :  { %v977_v16 = vsub.f32 %v953_v1, %v962_v57 }
0x1206   :  { %v985_v18 = vmul.f32 1.442695, %v977_v16 }
0x1208   :  { %1238 = vpow2.f32 %v985_v18 }
0x120b   :  { %v970_v37 = vpop.xlane.xlu0 %969 }
0x120c   :  { %963 = vmax.xlane.f32.xlu1 %v954_v13  ;;  %v981_v21 = vsub.f32 %v957_v8, %v970_v37 }
0x120e   :  { %v1239_v23 = vpop.eup %1238  ;;  %v993_v39 = vmul.f32 1.442695, %v981_v21 }
0x1214   :  { %971 = vmax.xlane.f32.xlu1 %v1678_v19 }
0x121c   :  { %1001 = vadd.xlane.f32.xlu1 %v1239_v23 }
0x1254   :  { %v773_v24 = vpop.permute.xlu1 %772 }
0x1255   :  { %v775_v26 = vmul.f32 %v773_v24, %v756_v53 }
0x1257   :  { %777 = vrot.lane.b32.xlu2 %v775_v26, %s1302_s20 }
0x127f   :  { %v964_v28 = vpop.xlane.xlu1 %963 }
0x1280   :  { %965 = vmax.xlane.f32.xlu2 %v1688_v29  ;;  %v978_v34 = vsub.f32 %v954_v13, %v964_v28 }
0x1282   :  { %v987_v36 = vmul.f32 1.442695, %v978_v34 }
0x1287   :  { %v1694_v31 = vpop.xlane.xlu1 %971 }
0x1288   :  { %967 = vmax.xlane.f32.xlu2 %v956_v32 }
0x128f   :  { %v1002_v38 = vpop.xlane.xlu1 %1001 }
0x1290   :  { %1240 = vlog2.f32 %v1002_v38  ;;  %973 = vmax.xlane.f32.xlu2 %v959_v20 }
0x1291   :  { %1242 = vpow2.f32 %v987_v36 }
0x1292   :  { %1244 = vpow2.f32 %v993_v39 }
0x1296   :  { %v1241_v11 = vpop.eup %1240 }
0x1297   :  { %v1243_v40 = vpop.eup %1242  ;;  %v1018_v22 = vmul.f32 0.6931472, %v1241_v11 }
0x1298   :  { %1003 = vadd.xlane.f32.xlu2 %v1243_v40  ;;  %v1245_v3 = vpop.eup %1244 }
0x1299   :  { %v1033_v42 = vadd.f32 %v1018_v22, %v962_v57 }
0x129b   :  { %v1041_v43 = vsub.f32 %v927_v0, %v1033_v42 }
0x129d   :  { %v1049_v2 = vsel %vm952_vm4, %v1041_v43, %v927_v0 }
0x129e   :  { %1057 = vst [vmem:[%s1793_s12] sm:$0xff] %v1049_v2 }
0x12a0   :  { %1009 = vadd.xlane.f32.xlu2 %v1245_v3 }
0x12b1   :  { %v778_v44 = vpop.permute.xlu2 %777 }
0x12b2   :  { %781 = vst.msk [vmem:[#allocation3 + $0x38] sm:$0xff] %vm155_vm1, %v778_v44 }
0x12b3   :  { %782 = vst.msk [vmem:[%s1794_s13] sm:$0xff] %vm155_vm1, %v778_v44 }
0x12b9   :  { %v795_v5 = vld [vmem:[#allocation3 + $0x38] sm:$0xff] }
0x12ba   :  { %1117 = vmatmul.msk.f32.gmra.mxu2 %vm155_vm1, %v795_v5 }
0x12f3   :  { %v1716_v45 = vpop.xlane.xlu2 %965 }
0x12fb   :  { %v968_v15 = vpop.xlane.xlu2 %967 }
0x12fc   :  { %v980_v7 = vsub.f32 %v956_v32, %v968_v15 }
0x12fe   :  { %v991_v46 = vmul.f32 1.442695, %v980_v7 }
0x1300   :  { %1246 = vpow2.f32 %v991_v46 }
0x1303   :  { %v974_v47 = vpop.xlane.xlu2 %973 }
0x1304   :  { %v983_v48 = vsub.f32 %v959_v20, %v974_v47 }
0x1306   :  { %v1247_v49 = vpop.eup %1246  ;;  %v997_v50 = vmul.f32 1.442695, %v983_v48 }
0x1307   :  { %1007 = vadd.xlane.f32.xlu1 %v1247_v49 }
0x1308   :  { %1248 = vpow2.f32 %v997_v50 }
0x130b   :  { %v1004_v51 = vpop.xlane.xlu2 %1003 }
0x130c   :  { %1250 = vlog2.f32 %v1004_v51 }
0x130e   :  { %v1249_v52 = vpop.eup %1248 }
0x130f   :  { %1013 = vadd.xlane.f32.xlu1 %v1249_v52 }
0x1312   :  { %v1251_v53 = vpop.eup %1250 }
0x1313   :  { %v1020_v58 = vmul.f32 0.6931472, %v1251_v53  ;;  %v1010_v41 = vpop.xlane.xlu2 %1009 }
0x1314   :  { %1252 = vlog2.f32 %v1010_v41 }
0x1315   :  { %v1034_v59 = vadd.f32 %v1020_v58, %v964_v28 }
0x1317   :  { %v1042_v60 = vsub.f32 %v1667_v12, %v1034_v59 }
0x1319   :  { %v1050_v62 = vsel %vm952_vm4, %v1042_v60, %v1667_v12 }
0x131a   :  { %v1253_v0 = vpop.eup %1252  ;;  %1058 = vst [vmem:[%s1793_s12 + $0x8] sm:$0xff] %v1050_v62 }
0x131b   :  { %v1026_v1 = vmul.f32 0.6931472, %v1253_v0 }
0x131d   :  { %v1037_v4 = vadd.f32 %v1026_v1, %v970_v37  ;;  %v982_v37 = vsub.f32 %v1678_v19, %v1694_v31 }
0x131f   :  { %v1045_v8 = vsub.f32 %v1656_v6, %v1037_v4 }
0x1321   :  { %v1053_v9 = vsel %vm952_vm4, %v1045_v8, %v1656_v6 }
0x1322   :  { %1061 = vst [vmem:[%s1793_s12 + $0x20] sm:$0xff] %v1053_v9 }
0x133d   :  { %v866_v54 = vpop.f32.mrf.mxu2 }
0x133e   :  { %v867_v10 = vadd.f32 %v1558_v25, %v866_v54 }
0x1340   :  { %1254 = vtanh.f32 %v867_v10 }
0x1346   :  { %v1255_v56 = vpop.eup %1254 }
0x1347   :  { %1125 = vmatmul.msk.f32.gmra.mxu3 %vm155_vm1, %v1255_v56 }
0x137a   :  { %v1008_v12 = vpop.xlane.xlu1 %1007 }
0x137b   :  { %1256 = vlog2.f32 %v1008_v12 }
0x1381   :  { %v1257_v57 = vpop.eup %1256 }
0x1382   :  { %v1024_v13 = vmul.f32 0.6931472, %v1257_v57  ;;  %v1014_v14 = vpop.xlane.xlu1 %1013 }
0x1383   :  { %1258 = vlog2.f32 %v1014_v14 }
0x1384   :  { %v1036_v16 = vadd.f32 %v1024_v13, %v968_v15 }
0x1386   :  { %v1044_v6 = vsub.f32 %v1692_v30, %v1036_v16 }
0x1388   :  { %v1052_v18 = vsel %vm952_vm4, %v1044_v6, %v1692_v30  ;;  %v979_v30 = vsub.f32 %v1688_v29, %v1716_v45 }
0x1389   :  { %v1259_v23 = vpop.eup %1258  ;;  %1060 = vst [vmem:[%s1793_s12 + $0x18] sm:$0xff] %v1052_v18 }
0x138a   :  { %v1030_v25 = vmul.f32 0.6931472, %v1259_v23  ;;  %v989_v33 = vmul.f32 1.442695, %v979_v30 }
0x138c   :  { %v1039_v24 = vadd.f32 %v1030_v25, %v974_v47  ;;  %1260 = vpow2.f32 %v989_v33 }
0x138e   :  { %v1047_v26 = vsub.f32 %v1700_v35, %v1039_v24 }
0x1390   :  { %v1055_v28 = vsel %vm952_vm4, %v1047_v26, %v1700_v35  ;;  %v995_v35 = vmul.f32 1.442695, %v982_v37 }
0x1391   :  { %1063 = vst [vmem:[%s1793_s12 + $0x30] sm:$0xff] %v1055_v28 }
0x1392   :  { %v1261_v38 = vpop.eup %1260  ;;  %1262 = vpow2.f32 %v995_v35 }
0x1398   :  { %v1263_v20 = vpop.eup %1262 }
0x13ca   :  { %v947_v32 = vpop.f32.mrf.mxu3 }
0x13cb   :  { %v948_v34 = vadd.f32 %v1647_v61, %v947_v32 }
0x13cd   :  { %v960_v36 = vsel %vm952_vm4, %v948_v34, -inf }
0x13ce   :  { %975 = vmax.xlane.f32.xlu0 %v960_v36 }
0x13d6   :  { %1005 = vadd.xlane.f32.xlu0 %v1261_v38 }
0x13de   :  { %1011 = vadd.xlane.f32.xlu0 %v1263_v20 }
0x13f2   :  { %784 = vrot.lane.b32.xlu0 %v1662_v55, %s1303_s16 }
0x1441   :  { %v976_v29 = vpop.xlane.xlu0 %975 }
0x1442   :  { %v984_v21 = vsub.f32 %v960_v36, %v976_v29 }
0x1444   :  { %v999_v61 = vmul.f32 1.442695, %v984_v21 }
0x1446   :  { %1264 = vpow2.f32 %v999_v61 }
0x1449   :  { %v1006_v39 = vpop.xlane.xlu0 %1005 }
0x144a   :  { %1266 = vlog2.f32 %v1006_v39 }
0x144c   :  { %v1265_v11 = vpop.eup %1264 }
0x144d   :  { %1015 = vadd.xlane.f32.xlu2 %v1265_v11 }
0x1450   :  { %v1267_v40 = vpop.eup %1266 }
0x1451   :  { %v1022_v19 = vmul.f32 0.6931472, %v1267_v40  ;;  %v1012_v22 = vpop.xlane.xlu0 %1011 }
0x1452   :  { %1268 = vlog2.f32 %v1012_v22 }
0x1453   :  { %v1035_v42 = vadd.f32 %v1022_v19, %v1716_v45 }
0x1455   :  { %v1043_v43 = vsub.f32 %v1683_v27, %v1035_v42 }
0x1457   :  { %v1051_v55 = vsel %vm952_vm4, %v1043_v43, %v1683_v27 }
0x1458   :  { %v1269_v2 = vpop.eup %1268  ;;  %1059 = vst [vmem:[%s1793_s12 + $0x10] sm:$0xff] %v1051_v55 }
0x1459   :  { %v1028_v3 = vmul.f32 0.6931472, %v1269_v2 }
0x145b   :  { %v1038_v44 = vadd.f32 %v1028_v3, %v1694_v31 }
0x145d   :  { %v1046_v5 = vsub.f32 %v1673_v17, %v1038_v44 }
0x145f   :  { %v1054_v45 = vsel %vm952_vm4, %v1046_v5, %v1673_v17 }
0x1460   :  { %1062 = vst [vmem:[%s1793_s12 + $0x28] sm:$0xff] %v1054_v45 }
0x1464   :  { %v785_v15 = vpop.permute.xlu0 %784 }
0x1465   :  { %787 = vst.msk [vmem:[%s1795_s14] sm:$0xff] %vm155_vm1, %v785_v15 }
0x14c0   :  { %v1016_v27 = vpop.xlane.xlu2 %1015 }
0x14c1   :  { %1270 = vlog2.f32 %v1016_v27 }
0x14c7   :  { %v1271_v7 = vpop.eup %1270 }
0x14c8   :  { %v1032_v31 = vmul.f32 0.6931472, %v1271_v7 }
0x14ca   :  { %v1040_v46 = vadd.f32 %v1032_v31, %v976_v29 }
0x14cc   :  { %v1048_v47 = vsub.f32 %v948_v34, %v1040_v46 }
0x14ce   :  { %v1056_v48 = vsel %vm952_vm4, %v1048_v47, %v948_v34 }
0x14cf   :  { %1064 = vst [vmem:[%s1793_s12 + $0x38] sm:$0xff] %v1056_v48 }
0x14d0   :  { %1077 = vsyncpa [#allocation5], 1 }

</bundles_post_ra>
